<compile_context>
chip_gen: v6e
topology: v6e:2x2x1
jax: 0.10.0
libtpu: 0.0.40
codegen_flags: <defaults>
</compile_context>

<pallas_src>
import jax
import jax.numpy as jnp
from jax.experimental import pallas as pl
from jax.experimental.pallas import tpu as pltpu

EPS = 1e-5


def bilinear_matrix(in_size: int, out_size: int) -> jnp.ndarray:
    """Interpolation matrix (out_size, in_size) for bilinear upsampling with
    align_corners=True (matches nn.Upsample(scale_factor=2, mode='bilinear',
    align_corners=True) in the PyTorch module)."""
    if out_size == 1:
        src = jnp.zeros((1,), jnp.float32)
    else:
        src = jnp.arange(out_size, dtype=jnp.float32) * (in_size - 1) / (out_size - 1)
    lo = jnp.floor(src).astype(jnp.int32)
    hi = jnp.minimum(lo + 1, in_size - 1)
    frac = src - lo.astype(jnp.float32)
    m = jnp.zeros((out_size, in_size), jnp.float32)
    rows = jnp.arange(out_size)
    m = m.at[rows, lo].add(1.0 - frac)
    m = m.at[rows, hi].add(frac)
    return m


def upsample_block(x, A, B, s1, b1, w_mat, s2, b2):
    """Fused UpSample block.  x: (N, C, H, W) f32 -> (N, Cout, 2H, 2W) f32.

    A: (2H, H), B: (2W, W) bilinear matrices (align_corners=True).
    w_mat: conv weight flattened to (Cout, 9*Cin), tap-major / channel-minor.
    s1/b1, s2/b2: folded inference-mode BN scale/bias (conv bias folded in b2).
    """
    N, C, H, W = x.shape
    H2, W2 = 2 * H, 2 * W
    S_in, S = H * W, H2 * W2
    Cout = w_mat.shape[0]

    # Grid sizing: an even number of steps keeps both v7x TensorCores busy;
    # NB items per step amortizes per-step pipeline overhead on v5e/v6e.
    if N % 2 == 0:
        G, NB = 2, N // 2
    else:
        G, NB = N, 1
    L = NB * S

    # Kronecker upsample operator: up_flat = x_flat @ U, with U = kron(A, B)^T.
    U = jnp.kron(A, B).T.astype(jnp.float32)                      # (H*W, H2*W2)

    # Per-step input slab, rows = c*NB + b (channel-major / batch-minor), so the
    # batched conv rhs is a plain reshape inside the kernel.
    x_steps = jnp.transpose(x, (1, 0, 2, 3)).reshape(C, G, NB, S_in)
    x_steps = jnp.transpose(x_steps, (1, 0, 2, 3)).reshape(G, C * NB, S_in)
    x_steps = x_steps.astype(jnp.float32)

    # Folded BN scale/bias as per-row columns (broadcast along lanes in-kernel).
    s1_col = jnp.repeat(s1.astype(jnp.float32), NB).reshape(C * NB, 1)
    b1_col = jnp.repeat(b1.astype(jnp.float32), NB).reshape(C * NB, 1)
    s2_col = s2.astype(jnp.float32).reshape(Cout, 1)
    b2_col = b2.astype(jnp.float32).reshape(Cout, 1)

    # Boundary masks for the shifted taps over the flattened (H2, W2) map:
    # rows: [i>=1, i<=H2-2, j>=1, j<=W2-2]; pattern repeats per item in a step.
    p = jnp.arange(S, dtype=jnp.int32)
    i, j = p // W2, p % W2
    masks = jnp.stack([i >= 1, i <= H2 - 2, j >= 1, j <= W2 - 2])
    masks = jnp.tile(masks.astype(jnp.float32), (1, NB))          # (4, NB*S)

    w_b = w_mat.astype(jnp.bfloat16)                              # (Cout, 9*C)

    def kernel(x_ref, u_ref, s1_ref, b1_ref, m_ref, w_ref, s2_ref, b2_ref,
               o_ref, slab_ref):
        # ---- bilinear x2 upsample: ONE Kron-operator MXU matmul ------------
        xm = x_ref[0]                                             # (C*NB, H*W)
        up = jnp.dot(xm, u_ref[...],
                     preferred_element_type=jnp.float32)          # (C*NB, S) f32

        # ---- BN1 (folded per-channel scale/bias) + ReLU --------------------
        y = jnp.maximum(up * s1_ref[...] + b1_ref[...], 0.0)
        # rows c*NB+b -> row c, lane b*S+p   (identity reshape when NB == 1)
        y = y.reshape(C, L)

        # ---- im2col taps via XLU rolls + boundary masks --------------------
        # slab row layout = tap-major / channel-minor, matching w_mat columns.
        # (static 3x3 unroll; for large C switch to pl.loop + pl.ds on tap idx)
        masks_v = m_ref[...]                                      # (4, L)
        for kh in range(3):
            for kw in range(3):
                dh, dw = kh - 1, kw - 1
                off = dh * W2 + dw
                tap = y if off == 0 else pltpu.roll(y, (-off) % L, axis=1)
                m = None
                if dh == -1:
                    m = masks_v[0:1, :]
                elif dh == 1:
                    m = masks_v[1:2, :]
                if dw == -1:
                    m = masks_v[2:3, :] if m is None else m * masks_v[2:3, :]
                elif dw == 1:
                    m = masks_v[3:4, :] if m is None else m * masks_v[3:4, :]
                if m is not None:
                    tap = tap * m
                t = kh * 3 + kw
                slab_ref[t * C:(t + 1) * C, :] = tap.astype(jnp.bfloat16)

        # ---- 3x3 conv = one bf16 MXU matmul over the im2col slab -----------
        acc = jnp.dot(w_ref[...], slab_ref[...],
                      preferred_element_type=jnp.float32)         # (Cout, NB*S)

        # ---- BN2 (folded) + ReLU, lane-dense per-item stores ---------------
        z = jnp.maximum(acc * s2_ref[...] + b2_ref[...], 0.0)
        for b in range(NB):
            o_ref[b] = z[:, b * S:(b + 1) * S]

    # TODO(synk): at production sizes, add a spatial tile axis for the conv
    # stage (slab scales as (9C, tile)) so scratch fits v7x's 64 MiB VMEM, raise
    # vmem_limit_bytes accordingly, and optionally emit bf16 output.
    out_flat = pl.pallas_call(
        kernel,
        out_shape=jax.ShapeDtypeStruct((N, Cout, S), jnp.float32),
        grid=(G,),
        in_specs=[
            pl.BlockSpec((1, C * NB, S_in), lambda g: (g, 0, 0)),   # x slab
            pl.BlockSpec((S_in, S), lambda g: (0, 0)),              # U (kron op)
            pl.BlockSpec((C * NB, 1), lambda g: (0, 0)),            # BN1 scale
            pl.BlockSpec((C * NB, 1), lambda g: (0, 0)),            # BN1 bias
            pl.BlockSpec((4, L), lambda g: (0, 0)),                 # tap masks
            pl.BlockSpec((Cout, 9 * C), lambda g: (0, 0)),          # conv weight
            pl.BlockSpec((Cout, 1), lambda g: (0, 0)),              # BN2 scale
            pl.BlockSpec((Cout, 1), lambda g: (0, 0)),              # BN2 bias
        ],
        out_specs=pl.BlockSpec((NB, Cout, S), lambda g: (g, 0, 0)),
        scratch_shapes=[pltpu.VMEM((9 * C, L), jnp.bfloat16)],      # im2col slab
        compiler_params=pltpu.CompilerParams(
            dimension_semantics=("parallel",)),
    )(x_steps, U, s1_col, b1_col, masks, w_b, s2_col, b2_col)

    return out_flat.reshape(N, Cout, H2, W2)   # pure reshape, stays NCHW


def ref_forward(x, A, BT, s1, b1, w_hwio, s2, b2):
    """Pure-JAX f32 reference with identical math (for validation)."""
    u = jnp.einsum('oh,nchw->ncow', A, x)
    u = jnp.einsum('ncow,wq->ncoq', u, BT)
    y = jnp.maximum(u * s1[None, :, None, None] + b1[None, :, None, None], 0.0)
    y_nhwc = jnp.transpose(y, (0, 2, 3, 1))
    z = jax.lax.conv_general_dilated(
        y_nhwc, w_hwio, (1, 1), 'SAME',
        dimension_numbers=('NHWC', 'HWIO', 'NHWC'))
    z = jnp.maximum(z * s2 + b2, 0.0)
    return jnp.transpose(z, (0, 3, 1, 2))


if __name__ == "__main__":
    N, Cin, H, W, Cout = 2, 4, 16, 16, 8
    H2, W2 = 2 * H, 2 * W

    keys = jax.random.split(jax.random.PRNGKey(0), 12)
    x = jax.random.normal(keys[0], (N, Cin, H, W), jnp.float32)

    # BN1 parameters / running stats (deterministic synthetic init)
    gamma1 = 0.5 + jax.random.uniform(keys[1], (Cin,), jnp.float32)
    beta1 = 0.1 * jax.random.normal(keys[2], (Cin,), jnp.float32)
    rmean1 = 0.1 * jax.random.normal(keys[3], (Cin,), jnp.float32)
    rvar1 = 0.5 + jax.random.uniform(keys[4], (Cin,), jnp.float32)

    # Conv2d(in_ch, out_ch, 3, padding='same') weight (OIHW) + bias
    w_oihw = jax.random.normal(keys[5], (Cout, Cin, 3, 3), jnp.float32) / jnp.sqrt(9.0 * Cin)
    conv_bias = 0.1 * jax.random.normal(keys[6], (Cout,), jnp.float32)

    # BN2 parameters / running stats
    gamma2 = 0.5 + jax.random.uniform(keys[7], (Cout,), jnp.float32)
    beta2 = 0.1 * jax.random.normal(keys[8], (Cout,), jnp.float32)
    rmean2 = 0.1 * jax.random.normal(keys[9], (Cout,), jnp.float32)
    rvar2 = 0.5 + jax.random.uniform(keys[10], (Cout,), jnp.float32)

    # Fold BN (inference mode) into per-channel scale/bias; conv bias folded in b2.
    s1 = gamma1 / jnp.sqrt(rvar1 + EPS)
    b1 = beta1 - s1 * rmean1
    s2 = gamma2 / jnp.sqrt(rvar2 + EPS)
    b2 = beta2 + s2 * (conv_bias - rmean2)

    # Bilinear (align_corners=True) interpolation matrices.
    A = bilinear_matrix(H, H2)            # (H2, H)
    B = bilinear_matrix(W, W2)            # (W2, W)

    # Conv weight layouts: (Cout, 9*Cin) tap-major for the kernel, HWIO for ref.
    w_mat = jnp.transpose(w_oihw, (0, 2, 3, 1)).reshape(Cout, 9 * Cin)
    w_hwio = jnp.transpose(w_oihw, (2, 3, 1, 0))

    out = upsample_block(x, A, B, s1, b1, w_mat, s2, b2)
    out = jax.block_until_ready(out)

    ref = ref_forward(x, A, B.T, s1, b1, w_hwio, s2, b2)
    assert out.shape == (N, Cout, H2, W2), out.shape
    max_err = float(jnp.max(jnp.abs(out - ref)))
    # bf16 conv operands with f32 accumulation vs pure-f32 reference.
    assert jnp.allclose(out, ref, atol=5e-2, rtol=5e-2), max_err
    print("KERNEL_OK")
</pallas_src>

<mosaic_0001>
module attributes {stable_mosaic.version = 11 : i64} {
  func.func @kernel(%arg0: i32, %arg1: memref<1x4x256xf32, #tpu.memory_space<vmem>>, %arg2: memref<256x1024xf32, #tpu.memory_space<vmem>>, %arg3: memref<4x1xf32, #tpu.memory_space<vmem>>, %arg4: memref<4x1xf32, #tpu.memory_space<vmem>>, %arg5: memref<4x1024xf32, #tpu.memory_space<vmem>>, %arg6: memref<8x36xbf16, #tpu.memory_space<vmem>>, %arg7: memref<8x1xf32, #tpu.memory_space<vmem>>, %arg8: memref<8x1xf32, #tpu.memory_space<vmem>>, %arg9: memref<1x8x1024xf32, #tpu.memory_space<vmem>>, %arg10: memref<36x1024xbf16, #tpu.memory_space<vmem>>) attributes {dimension_semantics = [#tpu.dimension_semantics<parallel>], iteration_bounds = array<i64: 2>, scalar_prefetch = 0 : i64, scratch_operands = 1 : i64, tpu.core_type = #tpu.core_type<tc>, window_params = [{transform_indices = @transform_0, window_bounds = array<i64: 1, 4, 256>}, {pipeline_mode = #tpu.pipeline_mode<synchronous>, transform_indices = @transform_1, window_bounds = array<i64: 256, 1024>}, {pipeline_mode = #tpu.pipeline_mode<synchronous>, transform_indices = @transform_2, window_bounds = array<i64: 4, 1>}, {pipeline_mode = #tpu.pipeline_mode<synchronous>, transform_indices = @transform_3, window_bounds = array<i64: 4, 1>}, {pipeline_mode = #tpu.pipeline_mode<synchronous>, transform_indices = @transform_4, window_bounds = array<i64: 4, 1024>}, {pipeline_mode = #tpu.pipeline_mode<synchronous>, transform_indices = @transform_5, window_bounds = array<i64: 8, 36>}, {pipeline_mode = #tpu.pipeline_mode<synchronous>, transform_indices = @transform_6, window_bounds = array<i64: 8, 1>}, {pipeline_mode = #tpu.pipeline_mode<synchronous>, transform_indices = @transform_7, window_bounds = array<i64: 8, 1>}, {transform_indices = @transform_8, window_bounds = array<i64: 1, 8, 1024>}]} {
    %c0 = arith.constant 0 : index
    %c0_0 = arith.constant 0 : index
    %c0_1 = arith.constant 0 : index
    %0 = vector.load %arg1[%c0, %c0_0, %c0_1] : memref<1x4x256xf32, #tpu.memory_space<vmem>>, vector<1x4x256xf32>
    %1 = vector.shape_cast %0 : vector<1x4x256xf32> to vector<4x256xf32>
    %c0_2 = arith.constant 0 : index
    %c0_3 = arith.constant 0 : index
    %2 = vector.load %arg2[%c0_2, %c0_3] : memref<256x1024xf32, #tpu.memory_space<vmem>>, vector<256x1024xf32>
    %cst = arith.constant dense<0.000000e+00> : vector<4x1024xf32>
    %3 = tpu.matmul %1, %2, %cst {dimension_numbers = #tpu.dot_dimension_numbers<[1], [0], [0], [1], [0, 0, 1, 1], [], []>} : vector<4x256xf32>, vector<256x1024xf32>, vector<4x1024xf32> -> vector<4x1024xf32>
    %c0_4 = arith.constant 0 : index
    %c0_5 = arith.constant 0 : index
    %4 = vector.load %arg3[%c0_4, %c0_5] : memref<4x1xf32, #tpu.memory_space<vmem>>, vector<4x1xf32>
    %5 = vector.broadcast %4 : vector<4x1xf32> to vector<4x1024xf32>
    %6 = arith.mulf %3, %5 : vector<4x1024xf32>
    %c0_6 = arith.constant 0 : index
    %c0_7 = arith.constant 0 : index
    %7 = vector.load %arg4[%c0_6, %c0_7] : memref<4x1xf32, #tpu.memory_space<vmem>>, vector<4x1xf32>
    %8 = vector.broadcast %7 : vector<4x1xf32> to vector<4x1024xf32>
    %9 = arith.addf %6, %8 : vector<4x1024xf32>
    %cst_8 = arith.constant 0.000000e+00 : f32
    %10 = vector.broadcast %cst_8 : f32 to vector<4x1024xf32>
    %11 = arith.maximumf %9, %10 : vector<4x1024xf32>
    %c0_9 = arith.constant 0 : index
    %c0_10 = arith.constant 0 : index
    %12 = vector.load %arg5[%c0_9, %c0_10] : memref<4x1024xf32, #tpu.memory_space<vmem>>, vector<4x1024xf32>
    %c33_i32 = arith.constant 33 : i32
    %13 = tpu.dynamic_rotate %11 by %c33_i32 dim 1 : vector<4x1024xf32>, i32 -> vector<4x1024xf32>
    %14 = vector.extract_strided_slice %12 {offsets = [0, 0], sizes = [1, 1024], strides = [1, 1]} : vector<4x1024xf32> to vector<1x1024xf32>
    %15 = vector.extract_strided_slice %12 {offsets = [2, 0], sizes = [1, 1024], strides = [1, 1]} : vector<4x1024xf32> to vector<1x1024xf32>
    %16 = arith.mulf %14, %15 : vector<1x1024xf32>
    %17 = vector.broadcast %16 : vector<1x1024xf32> to vector<4x1024xf32>
    %18 = arith.mulf %13, %17 : vector<4x1024xf32>
    %19 = arith.truncf %18 : vector<4x1024xf32> to vector<4x1024xbf16>
    %c0_11 = arith.constant 0 : index
    %c0_12 = arith.constant 0 : index
    %20 = vector.load %arg10[%c0_11, %c0_12] : memref<36x1024xbf16, #tpu.memory_space<vmem>>, vector<4x1024xbf16>
    tpu.vector_store %arg10[%c0_11, %c0_12], %19 {strides = array<i32>} : memref<36x1024xbf16, #tpu.memory_space<vmem>>, vector<4x1024xbf16>,
    %c32_i32 = arith.constant 32 : i32
    %21 = tpu.dynamic_rotate %11 by %c32_i32 dim 1 : vector<4x1024xf32>, i32 -> vector<4x1024xf32>
    %22 = vector.extract_strided_slice %12 {offsets = [0, 0], sizes = [1, 1024], strides = [1, 1]} : vector<4x1024xf32> to vector<1x1024xf32>
    %23 = vector.broadcast %22 : vector<1x1024xf32> to vector<4x1024xf32>
    %24 = arith.mulf %21, %23 : vector<4x1024xf32>
    %25 = arith.truncf %24 : vector<4x1024xf32> to vector<4x1024xbf16>
    %c4 = arith.constant 4 : index
    %c0_13 = arith.constant 0 : index
    %26 = vector.load %arg10[%c4, %c0_13] : memref<36x1024xbf16, #tpu.memory_space<vmem>>, vector<4x1024xbf16>
    tpu.vector_store %arg10[%c4, %c0_13], %25 {strides = array<i32>} : memref<36x1024xbf16, #tpu.memory_space<vmem>>, vector<4x1024xbf16>,
    %c31_i32 = arith.constant 31 : i32
    %27 = tpu.dynamic_rotate %11 by %c31_i32 dim 1 : vector<4x1024xf32>, i32 -> vector<4x1024xf32>
    %28 = vector.extract_strided_slice %12 {offsets = [0, 0], sizes = [1, 1024], strides = [1, 1]} : vector<4x1024xf32> to vector<1x1024xf32>
    %29 = vector.extract_strided_slice %12 {offsets = [3, 0], sizes = [1, 1024], strides = [1, 1]} : vector<4x1024xf32> to vector<1x1024xf32>
    %30 = arith.mulf %28, %29 : vector<1x1024xf32>
    %31 = vector.broadcast %30 : vector<1x1024xf32> to vector<4x1024xf32>
    %32 = arith.mulf %27, %31 : vector<4x1024xf32>
    %33 = arith.truncf %32 : vector<4x1024xf32> to vector<4x1024xbf16>
    %c8 = arith.constant 8 : index
    %c0_14 = arith.constant 0 : index
    %34 = vector.load %arg10[%c8, %c0_14] : memref<36x1024xbf16, #tpu.memory_space<vmem>>, vector<4x1024xbf16>
    tpu.vector_store %arg10[%c8, %c0_14], %33 {strides = array<i32>} : memref<36x1024xbf16, #tpu.memory_space<vmem>>, vector<4x1024xbf16>,
    %c1_i32 = arith.constant 1 : i32
    %35 = tpu.dynamic_rotate %11 by %c1_i32 dim 1 : vector<4x1024xf32>, i32 -> vector<4x1024xf32>
    %36 = vector.extract_strided_slice %12 {offsets = [2, 0], sizes = [1, 1024], strides = [1, 1]} : vector<4x1024xf32> to vector<1x1024xf32>
    %37 = vector.broadcast %36 : vector<1x1024xf32> to vector<4x1024xf32>
    %38 = arith.mulf %35, %37 : vector<4x1024xf32>
    %39 = arith.truncf %38 : vector<4x1024xf32> to vector<4x1024xbf16>
    %c12 = arith.constant 12 : index
    %c0_15 = arith.constant 0 : index
    %40 = vector.load %arg10[%c12, %c0_15] : memref<36x1024xbf16, #tpu.memory_space<vmem>>, vector<4x1024xbf16>
    tpu.vector_store %arg10[%c12, %c0_15], %39 {strides = array<i32>} : memref<36x1024xbf16, #tpu.memory_space<vmem>>, vector<4x1024xbf16>,
    %41 = arith.truncf %11 : vector<4x1024xf32> to vector<4x1024xbf16>
    %c16 = arith.constant 16 : index
    %c0_16 = arith.constant 0 : index
    %42 = vector.load %arg10[%c16, %c0_16] : memref<36x1024xbf16, #tpu.memory_space<vmem>>, vector<4x1024xbf16>
    tpu.vector_store %arg10[%c16, %c0_16], %41 {strides = array<i32>} : memref<36x1024xbf16, #tpu.memory_space<vmem>>, vector<4x1024xbf16>,
    %c1023_i32 = arith.constant 1023 : i32
    %43 = tpu.dynamic_rotate %11 by %c1023_i32 dim 1 : vector<4x1024xf32>, i32 -> vector<4x1024xf32>
    %44 = vector.extract_strided_slice %12 {offsets = [3, 0], sizes = [1, 1024], strides = [1, 1]} : vector<4x1024xf32> to vector<1x1024xf32>
    %45 = vector.broadcast %44 : vector<1x1024xf32> to vector<4x1024xf32>
    %46 = arith.mulf %43, %45 : vector<4x1024xf32>
    %47 = arith.truncf %46 : vector<4x1024xf32> to vector<4x1024xbf16>
    %c20 = arith.constant 20 : index
    %c0_17 = arith.constant 0 : index
    %48 = vector.load %arg10[%c20, %c0_17] : memref<36x1024xbf16, #tpu.memory_space<vmem>>, vector<4x1024xbf16>
    tpu.vector_store %arg10[%c20, %c0_17], %47 {strides = array<i32>} : memref<36x1024xbf16, #tpu.memory_space<vmem>>, vector<4x1024xbf16>,
    %c993_i32 = arith.constant 993 : i32
    %49 = tpu.dynamic_rotate %11 by %c993_i32 dim 1 : vector<4x1024xf32>, i32 -> vector<4x1024xf32>
    %50 = vector.extract_strided_slice %12 {offsets = [1, 0], sizes = [1, 1024], strides = [1, 1]} : vector<4x1024xf32> to vector<1x1024xf32>
    %51 = vector.extract_strided_slice %12 {offsets = [2, 0], sizes = [1, 1024], strides = [1, 1]} : vector<4x1024xf32> to vector<1x1024xf32>
    %52 = arith.mulf %50, %51 : vector<1x1024xf32>
    %53 = vector.broadcast %52 : vector<1x1024xf32> to vector<4x1024xf32>
    %54 = arith.mulf %49, %53 : vector<4x1024xf32>
    %55 = arith.truncf %54 : vector<4x1024xf32> to vector<4x1024xbf16>
    %c24 = arith.constant 24 : index
    %c0_18 = arith.constant 0 : index
    %56 = vector.load %arg10[%c24, %c0_18] : memref<36x1024xbf16, #tpu.memory_space<vmem>>, vector<4x1024xbf16>
    tpu.vector_store %arg10[%c24, %c0_18], %55 {strides = array<i32>} : memref<36x1024xbf16, #tpu.memory_space<vmem>>, vector<4x1024xbf16>,
    %c992_i32 = arith.constant 992 : i32
    %57 = tpu.dynamic_rotate %11 by %c992_i32 dim 1 : vector<4x1024xf32>, i32 -> vector<4x1024xf32>
    %58 = vector.extract_strided_slice %12 {offsets = [1, 0], sizes = [1, 1024], strides = [1, 1]} : vector<4x1024xf32> to vector<1x1024xf32>
    %59 = vector.broadcast %58 : vector<1x1024xf32> to vector<4x1024xf32>
    %60 = arith.mulf %57, %59 : vector<4x1024xf32>
    %61 = arith.truncf %60 : vector<4x1024xf32> to vector<4x1024xbf16>
    %c28 = arith.constant 28 : index
    %c0_19 = arith.constant 0 : index
    %62 = vector.load %arg10[%c28, %c0_19] : memref<36x1024xbf16, #tpu.memory_space<vmem>>, vector<4x1024xbf16>
    tpu.vector_store %arg10[%c28, %c0_19], %61 {strides = array<i32>} : memref<36x1024xbf16, #tpu.memory_space<vmem>>, vector<4x1024xbf16>,
    %c991_i32 = arith.constant 991 : i32
    %63 = tpu.dynamic_rotate %11 by %c991_i32 dim 1 : vector<4x1024xf32>, i32 -> vector<4x1024xf32>
    %64 = vector.extract_strided_slice %12 {offsets = [1, 0], sizes = [1, 1024], strides = [1, 1]} : vector<4x1024xf32> to vector<1x1024xf32>
    %65 = vector.extract_strided_slice %12 {offsets = [3, 0], sizes = [1, 1024], strides = [1, 1]} : vector<4x1024xf32> to vector<1x1024xf32>
    %66 = arith.mulf %64, %65 : vector<1x1024xf32>
    %67 = vector.broadcast %66 : vector<1x1024xf32> to vector<4x1024xf32>
    %68 = arith.mulf %63, %67 : vector<4x1024xf32>
    %69 = arith.truncf %68 : vector<4x1024xf32> to vector<4x1024xbf16>
    %c32 = arith.constant 32 : index
    %c0_20 = arith.constant 0 : index
    %70 = vector.load %arg10[%c32, %c0_20] : memref<36x1024xbf16, #tpu.memory_space<vmem>>, vector<4x1024xbf16>
    tpu.vector_store %arg10[%c32, %c0_20], %69 {strides = array<i32>} : memref<36x1024xbf16, #tpu.memory_space<vmem>>, vector<4x1024xbf16>,
    %c0_21 = arith.constant 0 : index
    %c0_22 = arith.constant 0 : index
    %71 = vector.load %arg6[%c0_21, %c0_22] : memref<8x36xbf16, #tpu.memory_space<vmem>>, vector<8x36xbf16>
    %c0_23 = arith.constant 0 : index
    %c0_24 = arith.constant 0 : index
    %72 = vector.load %arg10[%c0_23, %c0_24] : memref<36x1024xbf16, #tpu.memory_space<vmem>>, vector<36x1024xbf16>
    %cst_25 = arith.constant dense<0.000000e+00> : vector<8x1024xf32>
    %73 = tpu.matmul %71, %72, %cst_25 {dimension_numbers = #tpu.dot_dimension_numbers<[1], [0], [0], [1], [0, 0, 1, 1], [], []>} : vector<8x36xbf16>, vector<36x1024xbf16>, vector<8x1024xf32> -> vector<8x1024xf32>
    %c0_26 = arith.constant 0 : index
    %c0_27 = arith.constant 0 : index
    %74 = vector.load %arg7[%c0_26, %c0_27] : memref<8x1xf32, #tpu.memory_space<vmem>>, vector<8x1xf32>
    %75 = vector.broadcast %74 : vector<8x1xf32> to vector<8x1024xf32>
    %76 = arith.mulf %73, %75 : vector<8x1024xf32>
    %c0_28 = arith.constant 0 : index
    %c0_29 = arith.constant 0 : index
    %77 = vector.load %arg8[%c0_28, %c0_29] : memref<8x1xf32, #tpu.memory_space<vmem>>, vector<8x1xf32>
    %78 = vector.broadcast %77 : vector<8x1xf32> to vector<8x1024xf32>
    %79 = arith.addf %76, %78 : vector<8x1024xf32>
    %cst_30 = arith.constant 0.000000e+00 : f32
    %80 = vector.broadcast %cst_30 : f32 to vector<8x1024xf32>
    %81 = arith.maximumf %79, %80 : vector<8x1024xf32>
    %c0_31 = arith.constant 0 : index
    %c0_32 = arith.constant 0 : index
    %c0_33 = arith.constant 0 : index
    %82 = vector.load %arg9[%c0_31, %c0_32, %c0_33] : memref<1x8x1024xf32, #tpu.memory_space<vmem>>, vector<1x8x1024xf32>
    %83 = vector.shape_cast %82 : vector<1x8x1024xf32> to vector<8x1024xf32>
    %84 = vector.shape_cast %81 : vector<8x1024xf32> to vector<1x8x1024xf32>
    tpu.vector_store %arg9[%c0_31, %c0_32, %c0_33], %84 {strides = array<i32>} : memref<1x8x1024xf32, #tpu.memory_space<vmem>>, vector<1x8x1024xf32>,
    return
  }
  func.func @transform_0(%arg0: i32) -> (i32, i32, i32) {
    %c0_i32 = arith.constant 0 : i32
    %c0_i32_0 = arith.constant 0 : i32
    %c0_i32_1 = arith.constant 0 : i32
    return %arg0, %c0_i32, %c0_i32_0 : i32, i32, i32
  }
  func.func @transform_1(%arg0: i32) -> (i32, i32) {
    %c0_i32 = arith.constant 0 : i32
    %c0_i32_0 = arith.constant 0 : i32
    %c0_i32_1 = arith.constant 0 : i32
    return %c0_i32, %c0_i32_0 : i32, i32
  }
  func.func @transform_2(%arg0: i32) -> (i32, i32) {
    %c0_i32 = arith.constant 0 : i32
    %c0_i32_0 = arith.constant 0 : i32
    %c0_i32_1 = arith.constant 0 : i32
    return %c0_i32, %c0_i32_0 : i32, i32
  }
  func.func @transform_3(%arg0: i32) -> (i32, i32) {
    %c0_i32 = arith.constant 0 : i32
    %c0_i32_0 = arith.constant 0 : i32
    %c0_i32_1 = arith.constant 0 : i32
    return %c0_i32, %c0_i32_0 : i32, i32
  }
  func.func @transform_4(%arg0: i32) -> (i32, i32) {
    %c0_i32 = arith.constant 0 : i32
    %c0_i32_0 = arith.constant 0 : i32
    %c0_i32_1 = arith.constant 0 : i32
    return %c0_i32, %c0_i32_0 : i32, i32
  }
  func.func @transform_5(%arg0: i32) -> (i32, i32) {
    %c0_i32 = arith.constant 0 : i32
    %c0_i32_0 = arith.constant 0 : i32
    %c0_i32_1 = arith.constant 0 : i32
    return %c0_i32, %c0_i32_0 : i32, i32
  }
  func.func @transform_6(%arg0: i32) -> (i32, i32) {
    %c0_i32 = arith.constant 0 : i32
    %c0_i32_0 = arith.constant 0 : i32
    %c0_i32_1 = arith.constant 0 : i32
    return %c0_i32, %c0_i32_0 : i32, i32
  }
  func.func @transform_7(%arg0: i32) -> (i32, i32) {
    %c0_i32 = arith.constant 0 : i32
    %c0_i32_0 = arith.constant 0 : i32
    %c0_i32_1 = arith.constant 0 : i32
    return %c0_i32, %c0_i32_0 : i32, i32
  }
  func.func @transform_8(%arg0: i32) -> (i32, i32, i32) {
    %c0_i32 = arith.constant 0 : i32
    %c0_i32_0 = arith.constant 0 : i32
    %c0_i32_1 = arith.constant 0 : i32
    return %arg0, %c0_i32, %c0_i32_0 : i32, i32, i32
  }
}

</mosaic_0001>

<bundles_post_ra>
// kernel: tpu_custom_call.1
= control target key start
LH: loop header
LB: loop body
LE: loop exit
PB: predicated region body
PF: predicated region fallthrough
CT: control target
= control target key end

     0   :  { %s4058_s0 = inlined_call_operand.hbm [shape: f32[2,4,256], index: 0, kind: input, shape index: {}]   ;;  %s4059_s1 = inlined_call_operand.hbm [shape: f32[256,1024], index: 1, kind: input, shape index: {}]   ;;  %s4060_s2 = inlined_call_operand.vmem [shape: f32[4,1], index: 2, kind: input, shape index: {}]   ;;  %s4061_s3 = inlined_call_operand.vmem [shape: f32[4,1], index: 3, kind: input, shape index: {}]   ;;  %s4062_s4 = inlined_call_operand.vmem [shape: f32[4,1024], index: 4, kind: input, shape index: {}]   ;;  %s4063_s5 = inlined_call_operand.vmem [shape: bf16[8,36], index: 5, kind: input, shape index: {}]   ;;  %s4064_s6 = inlined_call_operand.vmem [shape: f32[8,1], index: 6, kind: input, shape index: {}]   ;;  %s4065_s7 = inlined_call_operand.vmem [shape: f32[8,1], index: 7, kind: input, shape index: {}]   ;;  %s4066_s8 = inlined_call_operand.hbm [shape: f32[2,8,1024], index: 8, kind: output, shape index: {}]  }
   0x1   :  { %4089 = sst [smem:[#allocation33_spill]] %s4059_s1 }
   0x2   :  { %13 = vsyncpa [#allocation4], 0 }
   0x3   :  { %15 = vsyncpa [#allocation4 + $0x1], 0 }
   0x4   :  { %16 = vsyncpa [#allocation7], 0 }
   0x5   :  { %17 = vsyncpa [#allocation5], 0 }
   0x6   :  { %19 = vsyncpa [#allocation5 + $0x1], 0  ;;  %s3038_s27 = smov 0   ;;  %s3040_s28 = smov 0  }
   0x7   :  { %s3042_s29 = smov 0   ;;  %s3044_s30 = smov 0  }
   0x8 LB: > { %s3059_s9 = sadd.s32 4294967295, %s2977_s30   ;;  %s2621_s10 = sadd.s32 4294967294, %s2977_s30   ;;  %s2977_s30 = sphi %s3044_s30, %s4146_s30   ;;  %s2973_s29 = sphi %s3042_s29, %s4150_s29   ;;  %s2969_s28 = sphi %s3040_s28, %s4149_s28   ;;  %s2965_s27 = sphi %s3038_s27, %s4148_s27  }
   0x9   : > { %p45_p0 = scmp.ne.s32.totalorder %s2969_s28, %s2965_s27  ;;  %p4069_p1 = scmp.eq.s32.totalorder %s3059_s9, 0 }
   0xa   : > { %p222_p3 = scmp.eq.s32.totalorder %s2621_s10, 1  ;;  %p2622_p5 = scmp.ge.s32.totalorder %s2977_s30, 1 }
   0xb   : > { %p3068_p4 = por %p4069_p1, %p45_p0  ;;  %p229_p7 = scmp.lt.s32.totalorder %s2977_s30, 3 }
   0xc   : > { %p3073_p6 = por %p222_p3, %p45_p0  ;;  %s2979_s14 = smov [#allocation6]  }
   0xd   : > { %s4090_s11 = scalar_select %p3068_p4, 1, 0 }
   0xe   : > { %s4091_s12 = scalar_select %p3073_p6, 1, 0 }
   0xf   : > { %p3078_p8 = pnand %p2622_p5, %p229_p7  ;;  %s241_s15 = sshll.u32 %s2979_s14, 4  ;;  %s242_s15 = int_to_ptr.vmem [resolvable:$true] %s241_s15 }
  0x10   : > { %s3092_s17 = sadd.s32 1, %s2977_s30   ;;  %s32_s18 = sadd.s32 1, %s2973_s29 }
  0x11   : > { %s4092_s13 = scalar_select %p3078_p8, 1, 0 }
  0x12   : > { %p2763_p9 = pneg %p3078_p8  ;;  %4094 = sst [smem:[#allocation12_spill]] %s3092_s17 }
  0x13   : > { %s29_s19 = ssub.s32 %s2977_s30, %s3092_s17  ;;  %s2866_s20 = scalar_lea.vmem %s242_s15, 32768 }
  0x14   : > { %p3087_p11 = pnand %p2763_p9, %p4069_p1  ;;  %p2867_p13 = scmp.ne.s32.totalorder %s242_s15, %s2866_s20 }
  0x15   : > { %p2874_p5 = scmp.lt.s32.totalorder %s242_s15, %s242_s15  ;;  %p2875_p7 = scmp.lt.s32.totalorder %s2866_s20, %s2866_s20 }
  0x16   : > { %p2857_p12 = pneg %p3087_p11 }
  0x17   : > { %p2876_p10 = por %p2875_p7, %p2874_p5 }
  0x18   : > { %p2869_p0 = pnand %p2867_p13, %p2857_p12 }
  0x1a   : > { %p2870_p3 = pneg %p2869_p0 }
  0x1c   : > { %p2877_p2 = pnand %p2876_p10, %p2870_p3 }
  0x1e   : > { %2880 = shalt.err (!%p2877_p2)
}
  0x1f   : > { %s2980_s21 = smov 1024   ;;  %s2981_s22 = smov 64  }
  0x20   : > { %s4095_s1 = sld [smem:[#allocation33_spill]]  ;;  %p30_p9 = scmp.eq.s32.totalorder %s29_s19, 0 }
  0x21   : > { %p39_p12 = scmp.ne.s32.totalorder %s2973_s29, %s2969_s28  ;;  %p40_p10 = scmp.eq.s32.totalorder %s2977_s30, 0 }
  0x22   : > { %p2776_p2 = scmp.lt.s32.totalorder %s2977_s30, 2  ;;  %p4097_p0 = scmp.eq.s32.totalorder %s3059_s9, 1 }
  0x23   : > { %s3109_s25 = scalar_select %p30_p9, %s2973_s29, %s32_s18  }
  0x24   : > { %p41_p13 = por %p40_p10, %p39_p12  ;;  %p3113_p3 = por %p4097_p0, %p39_p12 }
  0x25   : > { %4096 = sst [smem:[#allocation13_spill]] %s3109_s25  ;;  %s273_s10 = sand.u32 1, %s2973_s29  }
  0x26   : > { %2766 = dma.hbm_to_vmem [thread:$0]  (!%p3087_p11), %s4095_s1, 32768, %s242_s15, [#allocation7], %s2980_s21, %s2980_s21, %s2981_s22  }
  0x27   : > { %s4098_s26 = scalar_select %p3113_p3, 1, 0 }
  0x28   : > { %s2717_s14 = sshll.u32 %s2977_s30, 7  ;;  %s2625_s20 = sshll.u32 %s273_s10, 3 }
  0x29   : > { %s3122_s23 = scalar_lea.hbm %s4058_s0, %s2717_s14  ;;  %s277_s15 = scalar_lea.vmem [#allocation3], %s2625_s20 }
  0x2a   : > { %s285_s18 = sshll.u32 %s277_s15, 4  ;;  %p3124_p11 = pnand %p2776_p2, %p41_p13  ;;  %s286_s18 = int_to_ptr.vmem [resolvable:$true] %s285_s18 }
  0x2b   : > { %s274_s21 = scalar_lea.sflag [#allocation4], %s273_s10  ;;  %s2881_s22 = scalar_lea.hbm %s3122_s23, 128 }
  0x2c   : > { %p2882_p5 = scmp.ne.s32.totalorder %s3122_s23, %s2881_s22  ;;  %p2883_p7 = pneg %p3124_p11 }
  0x2d   : > { %s2886_s14 = scalar_lea.hbm %s4058_s0, 256  ;;  %p2887_p10 = scmp.lt.s32.totalorder %s3122_s23, %s4058_s0 }
  0x2e   : > { %p2884_p9 = pnand %p2883_p7, %p2882_p5  ;;  %p2888_p2 = scmp.lt.s32.totalorder %s2886_s14, %s2881_s22 }
  0x30   : > { %p2885_p12 = pneg %p2884_p9  ;;  %p2889_p13 = por %p2888_p2, %p2887_p10 }
  0x32   : > { %p2890_p0 = pnand %p2889_p13, %p2885_p12 }
  0x34   : > { %2893 = shalt.err (!%p2890_p0)
}
  0x35   : > { %s2894_s15 = scalar_lea.vmem %s286_s18, 128  ;;  %s2982_s10 = smov [#allocation3]  }
  0x36   : > { %p2895_p1 = scmp.ne.s32.totalorder %s286_s18, %s2894_s15  ;;  %s2899_s1 = sshll.u32 %s2982_s10, 4  ;;  %s2900_s1 = int_to_ptr.vmem [resolvable:$false] %s2899_s1 }
  0x37   : > { %s2901_s25 = scalar_lea.vmem %s2900_s1, 256  ;;  %p2902_p5 = scmp.lt.s32.totalorder %s286_s18, %s2900_s1 }
  0x38   : > { %p2897_p6 = pnand %p2895_p1, %p2883_p7  ;;  %p2903_p9 = scmp.lt.s32.totalorder %s2901_s25, %s2894_s15 }
  0x3a   : > { %p2898_p3 = pneg %p2897_p6  ;;  %p2904_p4 = por %p2903_p9, %p2902_p5 }
  0x3c   : > { %p2905_p8 = pnand %p2904_p4, %p2898_p3 }
  0x3e   : > { %2908 = shalt.err (!%p2905_p8)
}
  0x3f   : > { %2770 = dma.hbm_to_vmem [thread:$0]  (!%p3124_p11), %s3122_s23, 128, %s286_s18, %s274_s21  }
  0x40   : > { %p4100_p12 = scmp.ne.s32.totalorder %s4092_s13, 0 }
  0x42   : > { %294 = sbr.rel (%p4100_p12) target bundleno = 818 (0x332), region = 52 }
  0x47   : > { %s3145_s22 = sand.u32 1, %s2969_s28   ;;  %p4101_p1 = scmp.ne.s32.totalorder %s4090_s11, 0 }
  0x48   : > { %s2629_s17 = sshll.u32 %s3145_s22, 3  ;;  %s297_s24 = scalar_lea.sflag [#allocation4], %s3145_s22 }
  0x49   : > { %s3149_s1 = scalar_lea.vmem [#allocation3], %s2629_s17 }
  0x4a   : > { %2952 = dma.done.wait (%p4101_p1), %s297_s24, 128  }
  0x4b   : > { %2954 = vsyncadd (%p4101_p1), %s297_s24, 4294967168  ;;  %p4102_p4 = scmp.eq.s32.totalorder %s3059_s9, 0 }
  0x4d   : > { %2956 = dma.done.wait (%p4102_p4), [#allocation7], 32768   ;;  %p4103_p6 = pmov %p4102_p4 }
  0x4e   : > { %v460_v0 = vld [vmem:[#allocation6 + $0x3c8] sm:$0xff]  ;;  %v462_v1 = vld [vmem:[#allocation6 + $0x3d8] sm:$0xff]  ;;  %v459_v2 = vld [vmem:[#allocation6 + $0x3c0] sm:$0xff]  ;;  %s2984_s18 = smov 95   ;;  %s2985_s19 = smov 96   ;;  %vm2293_vm5 = vcmask 1041408  }
  0x4f   : > { %2958 = vsyncadd (%p4103_p6), [#allocation7], 4294934528  ;;  %598 = vmatprep.subr.mxu0 %v460_v0  ;;  %669 = vmatprep.subr.mxu1 %v462_v1  ;;  %v461_v3 = vld [vmem:[#allocation6 + $0x3d0] sm:$0xff]  ;;  %v452_v4 = vld [vmem:[#allocation6 + $0x388] sm:$0xff]  ;;  %s2986_s21 = smov 127   ;;  %s2987_s14 = smov 32  }
  0x50   : > { %v454_v5 = vld [vmem:[#allocation6 + $0x398] sm:$0xff]  ;;  %599 = vmatpush1.msra.mxu0 %v459_v2  ;;  %670 = vmatpush1.msra.mxu1 %v461_v3  ;;  %v451_v6 = vld [vmem:[#allocation6 + $0x380] sm:$0xff]  ;;  %v453_v7 = vld [vmem:[#allocation6 + $0x390] sm:$0xff]  ;;  %s2988_s16 = smov 97   ;;  %s2989_s20 = smov 33   ;;  %vm2289_vm9 = vcmask 293888  }
  0x51   : > { %v444_v8 = vld [vmem:[#allocation6 + $0x348] sm:$0xff]  ;;  %600 = vmatprep.subr.mxu0 %v452_v4  ;;  %671 = vmatprep.subr.mxu1 %v454_v5  ;;  %v446_v9 = vld [vmem:[#allocation6 + $0x358] sm:$0xff]  ;;  %v443_v10 = vld [vmem:[#allocation6 + $0x340] sm:$0xff]  ;;  %s2990_s15 = smov 1   ;;  %s2991_s10 = smov 31  }
  0x52   : > { %v445_v11 = vld [vmem:[#allocation6 + $0x350] sm:$0xff]  ;;  %601 = vmatpush1.msra.mxu0 %v451_v6  ;;  %672 = vmatpush1.msra.mxu1 %v453_v7  ;;  %v436_v12 = vld [vmem:[#allocation6 + $0x308] sm:$0xff]  ;;  %v438_v13 = vld [vmem:[#allocation6 + $0x318] sm:$0xff]  ;;  %s2754_s24 = sshll.u32 %s3059_s9, 10  ;;  %s2527_s23 = scalar_lea.sflag [#allocation5], %s3145_s22 }
  0x53   : > { %602 = vmatprep.subr.mxu0 %v444_v8  ;;  %673 = vmatprep.subr.mxu1 %v446_v9  ;;  %v435_v14 = vld [vmem:[#allocation6 + $0x300] sm:$0xff]  ;;  %v437_v15 = vld [vmem:[#allocation6 + $0x310] sm:$0xff]  ;;  %v428_v16 = vld [vmem:[#allocation6 + $0x2c8] sm:$0xff]  ;;  %s2539_s25 = scalar_lea.hbm %s4066_s8, %s2754_s24  ;;  %p4143_p3 = scmp.ne.s32.totalorder %s4098_s26, 0 }
  0x54   : > { %603 = vmatpush1.msra.mxu0 %v443_v10  ;;  %674 = vmatpush1.msra.mxu1 %v445_v11  ;;  %v430_v17 = vld [vmem:[#allocation6 + $0x2d8] sm:$0xff]  ;;  %v427_v18 = vld [vmem:[#allocation6 + $0x2c0] sm:$0xff]  ;;  %v429_v19 = vld [vmem:[#allocation6 + $0x2d0] sm:$0xff]  ;;  %s2992_s9 = smov [#allocation8]  }
  0x55   : > { %604 = vmatprep.subr.mxu0 %v436_v12  ;;  %675 = vmatprep.subr.mxu1 %v438_v13  ;;  %v420_v20 = vld [vmem:[#allocation6 + $0x288] sm:$0xff]  ;;  %v422_v21 = vld [vmem:[#allocation6 + $0x298] sm:$0xff]  ;;  %v419_v22 = vld [vmem:[#allocation6 + $0x280] sm:$0xff] }
  0x56   : > { %605 = vmatpush1.msra.mxu0 %v435_v14  ;;  %676 = vmatpush1.msra.mxu1 %v437_v15  ;;  %v421_v23 = vld [vmem:[#allocation6 + $0x290] sm:$0xff]  ;;  %v412_v24 = vld [vmem:[#allocation6 + $0x248] sm:$0xff]  ;;  %v414_v25 = vld [vmem:[#allocation6 + $0x258] sm:$0xff] }
  0x57   : > { %606 = vmatprep.subr.mxu0 %v428_v16  ;;  %677 = vmatprep.subr.mxu1 %v430_v17  ;;  %v411_v26 = vld [vmem:[#allocation6 + $0x240] sm:$0xff]  ;;  %v413_v27 = vld [vmem:[#allocation6 + $0x250] sm:$0xff]  ;;  %v404_v28 = vld [vmem:[#allocation6 + $0x208] sm:$0xff] }
  0x58   : > { %607 = vmatpush1.msra.mxu0 %v427_v18  ;;  %678 = vmatpush1.msra.mxu1 %v429_v19  ;;  %v406_v29 = vld [vmem:[#allocation6 + $0x218] sm:$0xff]  ;;  %v403_v30 = vld [vmem:[#allocation6 + $0x200] sm:$0xff]  ;;  %v405_v31 = vld [vmem:[#allocation6 + $0x210] sm:$0xff] }
  0x59   : > { %608 = vmatprep.subr.mxu0 %v420_v20  ;;  %679 = vmatprep.subr.mxu1 %v422_v21  ;;  %v396_v32 = vld [vmem:[#allocation6 + $0x1c8] sm:$0xff]  ;;  %v398_v33 = vld [vmem:[#allocation6 + $0x1d8] sm:$0xff]  ;;  %v395_v34 = vld [vmem:[#allocation6 + $0x1c0] sm:$0xff] }
  0x5a   : > { %609 = vmatpush1.msra.mxu0 %v419_v22  ;;  %680 = vmatpush1.msra.mxu1 %v421_v23  ;;  %v397_v35 = vld [vmem:[#allocation6 + $0x1d0] sm:$0xff]  ;;  %v388_v36 = vld [vmem:[#allocation6 + $0x188] sm:$0xff]  ;;  %v390_v37 = vld [vmem:[#allocation6 + $0x198] sm:$0xff] }
  0x5b   : > { %610 = vmatprep.subr.mxu0 %v412_v24  ;;  %681 = vmatprep.subr.mxu1 %v414_v25  ;;  %v387_v38 = vld [vmem:[#allocation6 + $0x180] sm:$0xff]  ;;  %v389_v39 = vld [vmem:[#allocation6 + $0x190] sm:$0xff]  ;;  %v380_v40 = vld [vmem:[#allocation6 + $0x148] sm:$0xff] }
  0x5c   : > { %611 = vmatpush1.msra.mxu0 %v411_v26  ;;  %682 = vmatpush1.msra.mxu1 %v413_v27  ;;  %v382_v41 = vld [vmem:[#allocation6 + $0x158] sm:$0xff]  ;;  %v379_v42 = vld [vmem:[#allocation6 + $0x140] sm:$0xff]  ;;  %v381_v43 = vld [vmem:[#allocation6 + $0x150] sm:$0xff] }
  0x5d   : > { %612 = vmatprep.subr.mxu0 %v404_v28  ;;  %683 = vmatprep.subr.mxu1 %v406_v29  ;;  %v372_v44 = vld [vmem:[#allocation6 + $0x108] sm:$0xff]  ;;  %v374_v45 = vld [vmem:[#allocation6 + $0x118] sm:$0xff]  ;;  %v371_v46 = vld [vmem:[#allocation6 + $0x100] sm:$0xff] }
  0x5e   : > { %613 = vmatpush1.msra.mxu0 %v403_v30  ;;  %684 = vmatpush1.msra.mxu1 %v405_v31  ;;  %v373_v47 = vld [vmem:[#allocation6 + $0x110] sm:$0xff]  ;;  %v364_v48 = vld [vmem:[#allocation6 + $0xc8] sm:$0xff]  ;;  %v366_v49 = vld [vmem:[#allocation6 + $0xd8] sm:$0xff] }
  0x5f   : > { %614 = vmatprep.subr.mxu0 %v396_v32  ;;  %685 = vmatprep.subr.mxu1 %v398_v33  ;;  %v363_v50 = vld [vmem:[#allocation6 + $0xc0] sm:$0xff]  ;;  %v365_v51 = vld [vmem:[#allocation6 + $0xd0] sm:$0xff]  ;;  %v356_v52 = vld [vmem:[#allocation6 + $0x88] sm:$0xff] }
  0x60   : > { %615 = vmatpush1.msra.mxu0 %v395_v34  ;;  %686 = vmatpush1.msra.mxu1 %v397_v35  ;;  %v358_v53 = vld [vmem:[#allocation6 + $0x98] sm:$0xff]  ;;  %v355_v54 = vld [vmem:[#allocation6 + $0x80] sm:$0xff]  ;;  %v357_v55 = vld [vmem:[#allocation6 + $0x90] sm:$0xff] }
  0x61   : > { %616 = vmatprep.subr.mxu0 %v388_v36  ;;  %687 = vmatprep.subr.mxu1 %v390_v37  ;;  %v348_v56 = vld [vmem:[#allocation6 + $0x48] sm:$0xff]  ;;  %v350_v57 = vld [vmem:[#allocation6 + $0x58] sm:$0xff]  ;;  %v347_v58 = vld [vmem:[#allocation6 + $0x40] sm:$0xff] }
  0x62   : > { %617 = vmatpush1.msra.mxu0 %v387_v38  ;;  %688 = vmatpush1.msra.mxu1 %v389_v39  ;;  %v349_v59 = vld [vmem:[#allocation6 + $0x50] sm:$0xff]  ;;  %v340_v60 = vld [vmem:[#allocation6 + $0x8] sm:$0xff]  ;;  %v342_v61 = vld [vmem:[#allocation6 + $0x18] sm:$0xff] }
  0x63   : > { %618 = vmatprep.subr.mxu0 %v380_v40  ;;  %689 = vmatprep.subr.mxu1 %v382_v41  ;;  %v339_v62 = vld [vmem:[#allocation6] sm:$0xff]  ;;  %v341_v63 = vld [vmem:[#allocation6 + $0x10] sm:$0xff]  ;;  %v588_v0 = vld [vmem:[#allocation6 + $0x7c8] sm:$0xff] }
  0x64   : > { %619 = vmatpush1.msra.mxu0 %v379_v42  ;;  %690 = vmatpush1.msra.mxu1 %v381_v43  ;;  %v590_v1 = vld [vmem:[#allocation6 + $0x7d8] sm:$0xff]  ;;  %v587_v2 = vld [vmem:[#allocation6 + $0x7c0] sm:$0xff]  ;;  %v589_v3 = vld [vmem:[#allocation6 + $0x7d0] sm:$0xff] }
  0x65   : > { %620 = vmatprep.subr.mxu0 %v372_v44  ;;  %691 = vmatprep.subr.mxu1 %v374_v45  ;;  %v580_v4 = vld [vmem:[#allocation6 + $0x788] sm:$0xff]  ;;  %v582_v5 = vld [vmem:[#allocation6 + $0x798] sm:$0xff]  ;;  %v579_v6 = vld [vmem:[#allocation6 + $0x780] sm:$0xff] }
  0x66   : > { %621 = vmatpush1.msra.mxu0 %v371_v46  ;;  %692 = vmatpush1.msra.mxu1 %v373_v47  ;;  %v581_v7 = vld [vmem:[#allocation6 + $0x790] sm:$0xff]  ;;  %v572_v8 = vld [vmem:[#allocation6 + $0x748] sm:$0xff]  ;;  %v574_v9 = vld [vmem:[#allocation6 + $0x758] sm:$0xff] }
  0x67   : > { %622 = vmatprep.subr.mxu0 %v364_v48  ;;  %693 = vmatprep.subr.mxu1 %v366_v49  ;;  %v571_v10 = vld [vmem:[#allocation6 + $0x740] sm:$0xff]  ;;  %v573_v11 = vld [vmem:[#allocation6 + $0x750] sm:$0xff]  ;;  %v564_v12 = vld [vmem:[#allocation6 + $0x708] sm:$0xff] }
  0x68   : > { %623 = vmatpush1.msra.mxu0 %v363_v50  ;;  %694 = vmatpush1.msra.mxu1 %v365_v51  ;;  %v566_v13 = vld [vmem:[#allocation6 + $0x718] sm:$0xff]  ;;  %v563_v14 = vld [vmem:[#allocation6 + $0x700] sm:$0xff]  ;;  %v565_v15 = vld [vmem:[#allocation6 + $0x710] sm:$0xff] }
  0x69   : > { %624 = vmatprep.subr.mxu0 %v356_v52  ;;  %695 = vmatprep.subr.mxu1 %v358_v53  ;;  %v556_v16 = vld [vmem:[#allocation6 + $0x6c8] sm:$0xff]  ;;  %v558_v17 = vld [vmem:[#allocation6 + $0x6d8] sm:$0xff]  ;;  %v555_v18 = vld [vmem:[#allocation6 + $0x6c0] sm:$0xff] }
  0x6a   : > { %625 = vmatpush1.msra.mxu0 %v355_v54  ;;  %696 = vmatpush1.msra.mxu1 %v357_v55  ;;  %v557_v19 = vld [vmem:[#allocation6 + $0x6d0] sm:$0xff]  ;;  %v548_v20 = vld [vmem:[#allocation6 + $0x688] sm:$0xff]  ;;  %v550_v21 = vld [vmem:[#allocation6 + $0x698] sm:$0xff] }
  0x6b   : > { %626 = vmatprep.subr.mxu0 %v348_v56  ;;  %697 = vmatprep.subr.mxu1 %v350_v57  ;;  %v547_v22 = vld [vmem:[#allocation6 + $0x680] sm:$0xff]  ;;  %v549_v23 = vld [vmem:[#allocation6 + $0x690] sm:$0xff]  ;;  %v540_v24 = vld [vmem:[#allocation6 + $0x648] sm:$0xff] }
  0x6c   : > { %627 = vmatpush1.msra.mxu0 %v347_v58  ;;  %698 = vmatpush1.msra.mxu1 %v349_v59  ;;  %v542_v25 = vld [vmem:[#allocation6 + $0x658] sm:$0xff]  ;;  %v539_v26 = vld [vmem:[#allocation6 + $0x640] sm:$0xff]  ;;  %v541_v27 = vld [vmem:[#allocation6 + $0x650] sm:$0xff] }
  0x6d   : > { %628 = vmatprep.subr.mxu0 %v340_v60  ;;  %699 = vmatprep.subr.mxu1 %v342_v61  ;;  %v532_v28 = vld [vmem:[#allocation6 + $0x608] sm:$0xff]  ;;  %v534_v29 = vld [vmem:[#allocation6 + $0x618] sm:$0xff]  ;;  %v531_v30 = vld [vmem:[#allocation6 + $0x600] sm:$0xff] }
  0x6e   : > { %629 = vmatpush1.msra.mxu0 %v339_v62  ;;  %700 = vmatpush1.msra.mxu1 %v341_v63  ;;  %v533_v31 = vld [vmem:[#allocation6 + $0x610] sm:$0xff]  ;;  %v524_v32 = vld [vmem:[#allocation6 + $0x5c8] sm:$0xff]  ;;  %v526_v33 = vld [vmem:[#allocation6 + $0x5d8] sm:$0xff] }
  0x6f   : > { %630 = vmatprep.subr.mxu0 %v588_v0  ;;  %701 = vmatprep.subr.mxu1 %v590_v1  ;;  %v523_v34 = vld [vmem:[#allocation6 + $0x5c0] sm:$0xff]  ;;  %v525_v35 = vld [vmem:[#allocation6 + $0x5d0] sm:$0xff]  ;;  %v516_v36 = vld [vmem:[#allocation6 + $0x588] sm:$0xff] }
  0x70   : > { %631 = vmatpush2.msra.mxu0 %v587_v2  ;;  %702 = vmatpush2.msra.mxu1 %v589_v3  ;;  %v518_v37 = vld [vmem:[#allocation6 + $0x598] sm:$0xff]  ;;  %v515_v38 = vld [vmem:[#allocation6 + $0x580] sm:$0xff]  ;;  %v517_v39 = vld [vmem:[#allocation6 + $0x590] sm:$0xff] }
  0x71   : > { %632 = vmatprep.subr.mxu0 %v580_v4  ;;  %703 = vmatprep.subr.mxu1 %v582_v5  ;;  %v508_v40 = vld [vmem:[#allocation6 + $0x548] sm:$0xff]  ;;  %v510_v41 = vld [vmem:[#allocation6 + $0x558] sm:$0xff]  ;;  %v507_v42 = vld [vmem:[#allocation6 + $0x540] sm:$0xff] }
  0x72   : > { %633 = vmatpush2.msra.mxu0 %v579_v6  ;;  %704 = vmatpush2.msra.mxu1 %v581_v7  ;;  %v509_v43 = vld [vmem:[#allocation6 + $0x550] sm:$0xff]  ;;  %v500_v44 = vld [vmem:[#allocation6 + $0x508] sm:$0xff]  ;;  %v502_v45 = vld [vmem:[#allocation6 + $0x518] sm:$0xff] }
  0x73   : > { %634 = vmatprep.subr.mxu0 %v572_v8  ;;  %705 = vmatprep.subr.mxu1 %v574_v9  ;;  %v499_v46 = vld [vmem:[#allocation6 + $0x500] sm:$0xff]  ;;  %v501_v47 = vld [vmem:[#allocation6 + $0x510] sm:$0xff]  ;;  %v492_v48 = vld [vmem:[#allocation6 + $0x4c8] sm:$0xff] }
  0x74   : > { %635 = vmatpush2.msra.mxu0 %v571_v10  ;;  %706 = vmatpush2.msra.mxu1 %v573_v11  ;;  %v494_v49 = vld [vmem:[#allocation6 + $0x4d8] sm:$0xff]  ;;  %v491_v50 = vld [vmem:[#allocation6 + $0x4c0] sm:$0xff]  ;;  %v493_v51 = vld [vmem:[#allocation6 + $0x4d0] sm:$0xff] }
  0x75   : > { %636 = vmatprep.subr.mxu0 %v564_v12  ;;  %707 = vmatprep.subr.mxu1 %v566_v13  ;;  %v484_v52 = vld [vmem:[#allocation6 + $0x488] sm:$0xff]  ;;  %v486_v53 = vld [vmem:[#allocation6 + $0x498] sm:$0xff]  ;;  %v483_v54 = vld [vmem:[#allocation6 + $0x480] sm:$0xff] }
  0x76   : > { %637 = vmatpush2.msra.mxu0 %v563_v14  ;;  %708 = vmatpush2.msra.mxu1 %v565_v15  ;;  %v485_v55 = vld [vmem:[#allocation6 + $0x490] sm:$0xff]  ;;  %v476_v57 = vld [vmem:[#allocation6 + $0x448] sm:$0xff]  ;;  %v478_v58 = vld [vmem:[#allocation6 + $0x458] sm:$0xff] }
  0x77   : > { %638 = vmatprep.subr.mxu0 %v556_v16  ;;  %709 = vmatprep.subr.mxu1 %v558_v17  ;;  %v3160_v56 = vld [vmem:[%s3149_s1] sm:$0xff]  ;;  %v475_v59 = vld [vmem:[#allocation6 + $0x440] sm:$0xff]  ;;  %v468_v61 = vld [vmem:[#allocation6 + $0x408] sm:$0xff] }
  0x78   : > { %639 = vmatpush2.msra.mxu0 %v555_v18  ;;  %710 = vmatpush2.msra.mxu1 %v557_v19  ;;  %v477_v60 = vld [vmem:[#allocation6 + $0x450] sm:$0xff]  ;;  %v470_v62 = vld [vmem:[#allocation6 + $0x418] sm:$0xff]  ;;  %v3164_v63 = vcombine.high %v3160_v56, %v3160_v56  ;;  %v467_v0 = vld [vmem:[#allocation6 + $0x400] sm:$0xff] }
  0x79   : > { %640 = vmatprep.subr.mxu0 %v548_v20  ;;  %711 = vmatprep.subr.mxu1 %v550_v21  ;;  %v469_v1 = vld [vmem:[#allocation6 + $0x410] sm:$0xff]  ;;  %v464_v2 = vld [vmem:[#allocation6 + $0x3e8] sm:$0xff]  ;;  %v466_v3 = vld [vmem:[#allocation6 + $0x3f8] sm:$0xff] }
  0x7a   : > { %641 = vmatpush2.msra.mxu0 %v547_v22  ;;  %712 = vmatpush2.msra.mxu1 %v549_v23  ;;  %v463_v4 = vld [vmem:[#allocation6 + $0x3e0] sm:$0xff]  ;;  %v465_v5 = vld [vmem:[#allocation6 + $0x3f0] sm:$0xff]  ;;  %v456_v6 = vld [vmem:[#allocation6 + $0x3a8] sm:$0xff] }
  0x7b   : > { %642 = vmatprep.subr.mxu0 %v540_v24  ;;  %713 = vmatprep.subr.mxu1 %v542_v25  ;;  %v458_v7 = vld [vmem:[#allocation6 + $0x3b8] sm:$0xff]  ;;  %v455_v8 = vld [vmem:[#allocation6 + $0x3a0] sm:$0xff]  ;;  %v457_v9 = vld [vmem:[#allocation6 + $0x3b0] sm:$0xff] }
  0x7c   : > { %643 = vmatpush2.msra.mxu0 %v539_v26  ;;  %714 = vmatpush2.msra.mxu1 %v541_v27  ;;  %v448_v10 = vld [vmem:[#allocation6 + $0x368] sm:$0xff]  ;;  %v450_v11 = vld [vmem:[#allocation6 + $0x378] sm:$0xff]  ;;  %v447_v12 = vld [vmem:[#allocation6 + $0x360] sm:$0xff] }
  0x7d   : > { %644 = vmatprep.subr.mxu0 %v532_v28  ;;  %715 = vmatprep.subr.mxu1 %v534_v29  ;;  %v449_v13 = vld [vmem:[#allocation6 + $0x370] sm:$0xff]  ;;  %v440_v14 = vld [vmem:[#allocation6 + $0x328] sm:$0xff]  ;;  %v442_v15 = vld [vmem:[#allocation6 + $0x338] sm:$0xff] }
  0x7e   : > { %645 = vmatpush2.msra.mxu0 %v531_v30  ;;  %716 = vmatpush2.msra.mxu1 %v533_v31  ;;  %v439_v16 = vld [vmem:[#allocation6 + $0x320] sm:$0xff]  ;;  %v441_v17 = vld [vmem:[#allocation6 + $0x330] sm:$0xff]  ;;  %v432_v18 = vld [vmem:[#allocation6 + $0x2e8] sm:$0xff] }
  0x7f   : > { %646 = vmatprep.subr.mxu0 %v524_v32  ;;  %717 = vmatprep.subr.mxu1 %v526_v33  ;;  %v434_v19 = vld [vmem:[#allocation6 + $0x2f8] sm:$0xff]  ;;  %v431_v20 = vld [vmem:[#allocation6 + $0x2e0] sm:$0xff]  ;;  %v433_v21 = vld [vmem:[#allocation6 + $0x2f0] sm:$0xff] }
  0x80   : > { %647 = vmatpush2.msra.mxu0 %v523_v34  ;;  %718 = vmatpush2.msra.mxu1 %v525_v35  ;;  %v424_v22 = vld [vmem:[#allocation6 + $0x2a8] sm:$0xff]  ;;  %v426_v23 = vld [vmem:[#allocation6 + $0x2b8] sm:$0xff]  ;;  %v423_v24 = vld [vmem:[#allocation6 + $0x2a0] sm:$0xff] }
  0x81   : > { %648 = vmatprep.subr.mxu0 %v516_v36  ;;  %719 = vmatprep.subr.mxu1 %v518_v37  ;;  %v425_v25 = vld [vmem:[#allocation6 + $0x2b0] sm:$0xff]  ;;  %v416_v26 = vld [vmem:[#allocation6 + $0x268] sm:$0xff]  ;;  %v418_v27 = vld [vmem:[#allocation6 + $0x278] sm:$0xff] }
  0x82   : > { %649 = vmatpush2.msra.mxu0 %v515_v38  ;;  %720 = vmatpush2.msra.mxu1 %v517_v39  ;;  %v415_v28 = vld [vmem:[#allocation6 + $0x260] sm:$0xff]  ;;  %v417_v29 = vld [vmem:[#allocation6 + $0x270] sm:$0xff]  ;;  %v408_v30 = vld [vmem:[#allocation6 + $0x228] sm:$0xff] }
  0x83   : > { %650 = vmatprep.subr.mxu0 %v508_v40  ;;  %721 = vmatprep.subr.mxu1 %v510_v41  ;;  %v410_v31 = vld [vmem:[#allocation6 + $0x238] sm:$0xff]  ;;  %v407_v32 = vld [vmem:[#allocation6 + $0x220] sm:$0xff]  ;;  %v409_v33 = vld [vmem:[#allocation6 + $0x230] sm:$0xff] }
  0x84   : > { %651 = vmatpush2.msra.mxu0 %v507_v42  ;;  %722 = vmatpush2.msra.mxu1 %v509_v43  ;;  %v400_v34 = vld [vmem:[#allocation6 + $0x1e8] sm:$0xff]  ;;  %v402_v35 = vld [vmem:[#allocation6 + $0x1f8] sm:$0xff]  ;;  %v399_v36 = vld [vmem:[#allocation6 + $0x1e0] sm:$0xff] }
  0x85   : > { %652 = vmatprep.subr.mxu0 %v500_v44  ;;  %723 = vmatprep.subr.mxu1 %v502_v45  ;;  %v401_v37 = vld [vmem:[#allocation6 + $0x1f0] sm:$0xff]  ;;  %v392_v38 = vld [vmem:[#allocation6 + $0x1a8] sm:$0xff]  ;;  %v394_v39 = vld [vmem:[#allocation6 + $0x1b8] sm:$0xff] }
  0x86   : > { %653 = vmatpush2.msra.mxu0 %v499_v46  ;;  %724 = vmatpush2.msra.mxu1 %v501_v47  ;;  %v391_v40 = vld [vmem:[#allocation6 + $0x1a0] sm:$0xff]  ;;  %v393_v41 = vld [vmem:[#allocation6 + $0x1b0] sm:$0xff]  ;;  %v384_v42 = vld [vmem:[#allocation6 + $0x168] sm:$0xff] }
  0x87   : > { %654 = vmatprep.subr.mxu0 %v492_v48  ;;  %725 = vmatprep.subr.mxu1 %v494_v49  ;;  %v386_v43 = vld [vmem:[#allocation6 + $0x178] sm:$0xff]  ;;  %v383_v44 = vld [vmem:[#allocation6 + $0x160] sm:$0xff]  ;;  %v385_v45 = vld [vmem:[#allocation6 + $0x170] sm:$0xff] }
  0x88   : > { %655 = vmatpush2.msra.mxu0 %v491_v50  ;;  %726 = vmatpush2.msra.mxu1 %v493_v51  ;;  %v376_v46 = vld [vmem:[#allocation6 + $0x128] sm:$0xff]  ;;  %v378_v47 = vld [vmem:[#allocation6 + $0x138] sm:$0xff]  ;;  %v375_v48 = vld [vmem:[#allocation6 + $0x120] sm:$0xff] }
  0x89   : > { %656 = vmatprep.subr.mxu0 %v484_v52  ;;  %727 = vmatprep.subr.mxu1 %v486_v53  ;;  %v377_v49 = vld [vmem:[#allocation6 + $0x130] sm:$0xff]  ;;  %v368_v50 = vld [vmem:[#allocation6 + $0xe8] sm:$0xff]  ;;  %v370_v51 = vld [vmem:[#allocation6 + $0xf8] sm:$0xff] }
  0x8a   : > { %657 = vmatpush2.msra.mxu0 %v483_v54  ;;  %728 = vmatpush2.msra.mxu1 %v485_v55  ;;  %v367_v52 = vld [vmem:[#allocation6 + $0xe0] sm:$0xff]  ;;  %v369_v53 = vld [vmem:[#allocation6 + $0xf0] sm:$0xff]  ;;  %v360_v54 = vld [vmem:[#allocation6 + $0xa8] sm:$0xff] }
  0x8b   : > { %658 = vmatprep.subr.mxu0 %v476_v57  ;;  %729 = vmatprep.subr.mxu1 %v478_v58  ;;  %v362_v55 = vld [vmem:[#allocation6 + $0xb8] sm:$0xff]  ;;  %v359_v57 = vld [vmem:[#allocation6 + $0xa0] sm:$0xff]  ;;  %v361_v58 = vld [vmem:[#allocation6 + $0xb0] sm:$0xff] }
  0x8c   : > { %659 = vmatpush2.msra.mxu0 %v475_v59  ;;  %730 = vmatpush2.msra.mxu1 %v477_v60  ;;  %v352_v59 = vld [vmem:[#allocation6 + $0x68] sm:$0xff]  ;;  %v354_v60 = vld [vmem:[#allocation6 + $0x78] sm:$0xff] }
  0x8d   : > { %660 = vmatprep.subr.mxu0 %v468_v61  ;;  %731 = vmatprep.subr.mxu1 %v470_v62  ;;  %v351_v61 = vld [vmem:[#allocation6 + $0x60] sm:$0xff]  ;;  %v353_v62 = vld [vmem:[#allocation6 + $0x70] sm:$0xff] }
  0x8e   : > { %661 = vmatpush2.msra.mxu0 %v467_v0  ;;  %662 = vmatprep.mubr.f32.mxu0 %v3164_v63  ;;  %v344_v0 = vld [vmem:[#allocation6 + $0x28] sm:$0xff] }
  0x8f   : > { %732 = vmatpush2.msra.mxu1 %v469_v1  ;;  %733 = vmatprep.mubr.f32.mxu1 %v3164_v63  ;;  %v346_v1 = vld [vmem:[#allocation6 + $0x38] sm:$0xff] }
  0x90   : > { %663 = vmatmul.mubr.f32.vlgmr.msra.gmra.mxu0 %v3160_v56  ;;  %734 = vmatmul.mubr.f32.vlgmr.msra.gmra.mxu1 %v3160_v56 }
  0x91   : > { %740 = vmatprep.subr.mxu0 %v464_v2  ;;  %811 = vmatprep.subr.mxu1 %v466_v3  ;;  %v343_v2 = vld [vmem:[#allocation6 + $0x20] sm:$0xff]  ;;  %v345_v3 = vld [vmem:[#allocation6 + $0x30] sm:$0xff] }
  0x92   : > { %741 = vmatpush1.msra.mxu0 %v463_v4  ;;  %812 = vmatpush1.msra.mxu1 %v465_v5  ;;  %v592_v4 = vld [vmem:[#allocation6 + $0x7e8] sm:$0xff]  ;;  %v594_v5 = vld [vmem:[#allocation6 + $0x7f8] sm:$0xff] }
  0x93   : > { %742 = vmatprep.subr.mxu0 %v456_v6  ;;  %813 = vmatprep.subr.mxu1 %v458_v7  ;;  %v591_v6 = vld [vmem:[#allocation6 + $0x7e0] sm:$0xff]  ;;  %v593_v7 = vld [vmem:[#allocation6 + $0x7f0] sm:$0xff] }
  0x94   : > { %743 = vmatpush1.msra.mxu0 %v455_v8  ;;  %814 = vmatpush1.msra.mxu1 %v457_v9  ;;  %v584_v8 = vld [vmem:[#allocation6 + $0x7a8] sm:$0xff]  ;;  %v586_v9 = vld [vmem:[#allocation6 + $0x7b8] sm:$0xff] }
  0x95   : > { %744 = vmatprep.subr.mxu0 %v448_v10  ;;  %815 = vmatprep.subr.mxu1 %v450_v11  ;;  %v583_v10 = vld [vmem:[#allocation6 + $0x7a0] sm:$0xff]  ;;  %v585_v11 = vld [vmem:[#allocation6 + $0x7b0] sm:$0xff] }
  0x96   : > { %745 = vmatpush1.msra.mxu0 %v447_v12  ;;  %816 = vmatpush1.msra.mxu1 %v449_v13  ;;  %v576_v12 = vld [vmem:[#allocation6 + $0x768] sm:$0xff]  ;;  %v578_v13 = vld [vmem:[#allocation6 + $0x778] sm:$0xff] }
  0x97   : > { %746 = vmatprep.subr.mxu0 %v440_v14  ;;  %817 = vmatprep.subr.mxu1 %v442_v15  ;;  %v575_v14 = vld [vmem:[#allocation6 + $0x760] sm:$0xff]  ;;  %v577_v15 = vld [vmem:[#allocation6 + $0x770] sm:$0xff] }
  0x98   : > { %747 = vmatpush1.msra.mxu0 %v439_v16  ;;  %818 = vmatpush1.msra.mxu1 %v441_v17  ;;  %v568_v16 = vld [vmem:[#allocation6 + $0x728] sm:$0xff]  ;;  %v570_v17 = vld [vmem:[#allocation6 + $0x738] sm:$0xff] }
  0x99   : > { %748 = vmatprep.subr.mxu0 %v432_v18  ;;  %819 = vmatprep.subr.mxu1 %v434_v19  ;;  %v567_v18 = vld [vmem:[#allocation6 + $0x720] sm:$0xff]  ;;  %v569_v19 = vld [vmem:[#allocation6 + $0x730] sm:$0xff] }
  0x9a   : > { %749 = vmatpush1.msra.mxu0 %v431_v20  ;;  %820 = vmatpush1.msra.mxu1 %v433_v21  ;;  %v560_v20 = vld [vmem:[#allocation6 + $0x6e8] sm:$0xff]  ;;  %v562_v21 = vld [vmem:[#allocation6 + $0x6f8] sm:$0xff] }
  0x9b   : > { %750 = vmatprep.subr.mxu0 %v424_v22  ;;  %821 = vmatprep.subr.mxu1 %v426_v23  ;;  %v559_v22 = vld [vmem:[#allocation6 + $0x6e0] sm:$0xff]  ;;  %v561_v23 = vld [vmem:[#allocation6 + $0x6f0] sm:$0xff] }
  0x9c   : > { %751 = vmatpush1.msra.mxu0 %v423_v24  ;;  %822 = vmatpush1.msra.mxu1 %v425_v25  ;;  %v552_v24 = vld [vmem:[#allocation6 + $0x6a8] sm:$0xff]  ;;  %v554_v25 = vld [vmem:[#allocation6 + $0x6b8] sm:$0xff] }
  0x9d   : > { %752 = vmatprep.subr.mxu0 %v416_v26  ;;  %823 = vmatprep.subr.mxu1 %v418_v27  ;;  %v551_v26 = vld [vmem:[#allocation6 + $0x6a0] sm:$0xff]  ;;  %v553_v27 = vld [vmem:[#allocation6 + $0x6b0] sm:$0xff] }
  0x9e   : > { %753 = vmatpush1.msra.mxu0 %v415_v28  ;;  %824 = vmatpush1.msra.mxu1 %v417_v29  ;;  %v544_v28 = vld [vmem:[#allocation6 + $0x668] sm:$0xff]  ;;  %v546_v29 = vld [vmem:[#allocation6 + $0x678] sm:$0xff] }
  0x9f   : > { %754 = vmatprep.subr.mxu0 %v408_v30  ;;  %825 = vmatprep.subr.mxu1 %v410_v31  ;;  %v543_v30 = vld [vmem:[#allocation6 + $0x660] sm:$0xff]  ;;  %v545_v31 = vld [vmem:[#allocation6 + $0x670] sm:$0xff] }
  0xa0   : > { %755 = vmatpush1.msra.mxu0 %v407_v32  ;;  %826 = vmatpush1.msra.mxu1 %v409_v33  ;;  %v536_v32 = vld [vmem:[#allocation6 + $0x628] sm:$0xff]  ;;  %v538_v33 = vld [vmem:[#allocation6 + $0x638] sm:$0xff] }
  0xa1   : > { %756 = vmatprep.subr.mxu0 %v400_v34  ;;  %827 = vmatprep.subr.mxu1 %v402_v35  ;;  %v535_v34 = vld [vmem:[#allocation6 + $0x620] sm:$0xff]  ;;  %v537_v35 = vld [vmem:[#allocation6 + $0x630] sm:$0xff] }
  0xa2   : > { %757 = vmatpush1.msra.mxu0 %v399_v36  ;;  %828 = vmatpush1.msra.mxu1 %v401_v37  ;;  %v528_v36 = vld [vmem:[#allocation6 + $0x5e8] sm:$0xff]  ;;  %v530_v37 = vld [vmem:[#allocation6 + $0x5f8] sm:$0xff] }
  0xa3   : > { %758 = vmatprep.subr.mxu0 %v392_v38  ;;  %829 = vmatprep.subr.mxu1 %v394_v39  ;;  %v527_v38 = vld [vmem:[#allocation6 + $0x5e0] sm:$0xff]  ;;  %v529_v39 = vld [vmem:[#allocation6 + $0x5f0] sm:$0xff] }
  0xa4   : > { %759 = vmatpush1.msra.mxu0 %v391_v40  ;;  %830 = vmatpush1.msra.mxu1 %v393_v41  ;;  %v520_v40 = vld [vmem:[#allocation6 + $0x5a8] sm:$0xff]  ;;  %v522_v41 = vld [vmem:[#allocation6 + $0x5b8] sm:$0xff] }
  0xa5   : > { %760 = vmatprep.subr.mxu0 %v384_v42  ;;  %831 = vmatprep.subr.mxu1 %v386_v43  ;;  %v519_v42 = vld [vmem:[#allocation6 + $0x5a0] sm:$0xff]  ;;  %v521_v43 = vld [vmem:[#allocation6 + $0x5b0] sm:$0xff] }
  0xa6   : > { %761 = vmatpush1.msra.mxu0 %v383_v44  ;;  %832 = vmatpush1.msra.mxu1 %v385_v45  ;;  %v512_v44 = vld [vmem:[#allocation6 + $0x568] sm:$0xff]  ;;  %v514_v45 = vld [vmem:[#allocation6 + $0x578] sm:$0xff] }
  0xa7   : > { %762 = vmatprep.subr.mxu0 %v376_v46  ;;  %833 = vmatprep.subr.mxu1 %v378_v47  ;;  %v511_v46 = vld [vmem:[#allocation6 + $0x560] sm:$0xff]  ;;  %v513_v47 = vld [vmem:[#allocation6 + $0x570] sm:$0xff] }
  0xa8   : > { %763 = vmatpush1.msra.mxu0 %v375_v48  ;;  %834 = vmatpush1.msra.mxu1 %v377_v49  ;;  %v504_v48 = vld [vmem:[#allocation6 + $0x528] sm:$0xff]  ;;  %v506_v49 = vld [vmem:[#allocation6 + $0x538] sm:$0xff] }
  0xa9   : > { %764 = vmatprep.subr.mxu0 %v368_v50  ;;  %835 = vmatprep.subr.mxu1 %v370_v51  ;;  %v503_v50 = vld [vmem:[#allocation6 + $0x520] sm:$0xff]  ;;  %v505_v51 = vld [vmem:[#allocation6 + $0x530] sm:$0xff] }
  0xaa   : > { %765 = vmatpush1.msra.mxu0 %v367_v52  ;;  %836 = vmatpush1.msra.mxu1 %v369_v53  ;;  %v496_v52 = vld [vmem:[#allocation6 + $0x4e8] sm:$0xff]  ;;  %v498_v53 = vld [vmem:[#allocation6 + $0x4f8] sm:$0xff] }
  0xab   : > { %766 = vmatprep.subr.mxu0 %v360_v54  ;;  %837 = vmatprep.subr.mxu1 %v362_v55  ;;  %v495_v54 = vld [vmem:[#allocation6 + $0x4e0] sm:$0xff]  ;;  %v497_v55 = vld [vmem:[#allocation6 + $0x4f0] sm:$0xff] }
  0xac   : > { %767 = vmatpush1.msra.mxu0 %v359_v57  ;;  %838 = vmatpush1.msra.mxu1 %v361_v58  ;;  %v488_v57 = vld [vmem:[#allocation6 + $0x4a8] sm:$0xff]  ;;  %v490_v58 = vld [vmem:[#allocation6 + $0x4b8] sm:$0xff] }
  0xad   : > { %768 = vmatprep.subr.mxu0 %v352_v59  ;;  %839 = vmatprep.subr.mxu1 %v354_v60  ;;  %v487_v59 = vld [vmem:[#allocation6 + $0x4a0] sm:$0xff]  ;;  %v489_v60 = vld [vmem:[#allocation6 + $0x4b0] sm:$0xff] }
  0xae   : > { %769 = vmatpush1.msra.mxu0 %v351_v61  ;;  %840 = vmatpush1.msra.mxu1 %v353_v62  ;;  %v480_v61 = vld [vmem:[#allocation6 + $0x468] sm:$0xff]  ;;  %v482_v62 = vld [vmem:[#allocation6 + $0x478] sm:$0xff] }
  0xaf   : > { %770 = vmatprep.subr.mxu0 %v344_v0  ;;  %841 = vmatprep.subr.mxu1 %v346_v1  ;;  %v479_v0 = vld [vmem:[#allocation6 + $0x460] sm:$0xff]  ;;  %v481_v1 = vld [vmem:[#allocation6 + $0x470] sm:$0xff] }
  0xb0   : > { %771 = vmatpush1.msra.mxu0 %v343_v2  ;;  %842 = vmatpush1.msra.mxu1 %v345_v3  ;;  %v472_v2 = vld [vmem:[#allocation6 + $0x428] sm:$0xff]  ;;  %v474_v3 = vld [vmem:[#allocation6 + $0x438] sm:$0xff] }
  0xb1   : > { %772 = vmatprep.subr.mxu0 %v592_v4  ;;  %843 = vmatprep.subr.mxu1 %v594_v5  ;;  %v882_v4 = vld [vmem:[%s4060_s2] sm:$0xf]  ;;  %v471_v5 = vld [vmem:[#allocation6 + $0x420] sm:$0xff] }
  0xb2   : > { %773 = vmatpush2.msra.mxu0 %v591_v6  ;;  %844 = vmatpush2.msra.mxu1 %v593_v7  ;;  %v4073_v6 = vmov 0   ;;  %v473_v7 = vld [vmem:[#allocation6 + $0x430] sm:$0xff] }
  0xb3   : > { %774 = vmatprep.subr.mxu0 %v584_v8  ;;  %845 = vmatprep.subr.mxu1 %v586_v9  ;;  %v896_v8 = vld [vmem:[%s4061_s3] sm:$0xf] }
  0xb4   : > { %775 = vmatpush2.msra.mxu0 %v583_v10  ;;  %846 = vmatpush2.msra.mxu1 %v585_v11 }
  0xb5   : > { %776 = vmatprep.subr.mxu0 %v576_v12  ;;  %847 = vmatprep.subr.mxu1 %v578_v13 }
  0xb6   : > { %777 = vmatpush2.msra.mxu0 %v575_v14  ;;  %848 = vmatpush2.msra.mxu1 %v577_v15 }
  0xb7   : > { %778 = vmatprep.subr.mxu0 %v568_v16  ;;  %849 = vmatprep.subr.mxu1 %v570_v17 }
  0xb8   : > { %779 = vmatpush2.msra.mxu0 %v567_v18  ;;  %850 = vmatpush2.msra.mxu1 %v569_v19 }
  0xb9   : > { %780 = vmatprep.subr.mxu0 %v560_v20  ;;  %851 = vmatprep.subr.mxu1 %v562_v21 }
  0xba   : > { %781 = vmatpush2.msra.mxu0 %v559_v22  ;;  %852 = vmatpush2.msra.mxu1 %v561_v23 }
  0xbb   : > { %782 = vmatprep.subr.mxu0 %v552_v24  ;;  %853 = vmatprep.subr.mxu1 %v554_v25 }
  0xbc   : > { %783 = vmatpush2.msra.mxu0 %v551_v26  ;;  %854 = vmatpush2.msra.mxu1 %v553_v27 }
  0xbd   : > { %784 = vmatprep.subr.mxu0 %v544_v28  ;;  %855 = vmatprep.subr.mxu1 %v546_v29 }
  0xbe   : > { %785 = vmatpush2.msra.mxu0 %v543_v30  ;;  %856 = vmatpush2.msra.mxu1 %v545_v31 }
  0xbf   : > { %786 = vmatprep.subr.mxu0 %v536_v32  ;;  %857 = vmatprep.subr.mxu1 %v538_v33 }
  0xc0   : > { %787 = vmatpush2.msra.mxu0 %v535_v34  ;;  %858 = vmatpush2.msra.mxu1 %v537_v35 }
  0xc1   : > { %788 = vmatprep.subr.mxu0 %v528_v36  ;;  %859 = vmatprep.subr.mxu1 %v530_v37 }
  0xc2   : > { %789 = vmatpush2.msra.mxu0 %v527_v38  ;;  %860 = vmatpush2.msra.mxu1 %v529_v39 }
  0xc3   : > { %790 = vmatprep.subr.mxu0 %v520_v40  ;;  %861 = vmatprep.subr.mxu1 %v522_v41 }
  0xc4   : > { %791 = vmatpush2.msra.mxu0 %v519_v42  ;;  %862 = vmatpush2.msra.mxu1 %v521_v43 }
  0xc5   : > { %792 = vmatprep.subr.mxu0 %v512_v44  ;;  %863 = vmatprep.subr.mxu1 %v514_v45 }
  0xc6   : > { %793 = vmatpush2.msra.mxu0 %v511_v46  ;;  %864 = vmatpush2.msra.mxu1 %v513_v47 }
  0xc7   : > { %794 = vmatprep.subr.mxu0 %v504_v48  ;;  %865 = vmatprep.subr.mxu1 %v506_v49 }
  0xc8   : > { %795 = vmatpush2.msra.mxu0 %v503_v50  ;;  %866 = vmatpush2.msra.mxu1 %v505_v51  ;;  %v938_v51 = vlaneseq }
  0xc9   : > { %796 = vmatprep.subr.mxu0 %v496_v52  ;;  %867 = vmatprep.subr.mxu1 %v498_v53 }
  0xca   : > { %797 = vmatpush2.msra.mxu0 %v495_v54  ;;  %868 = vmatpush2.msra.mxu1 %v497_v55  ;;  %v2482_v54 = vld [vmem:[%s4064_s6] sm:$0xff]  ;;  %v3287_v55 = vshrl.u32 %v938_v51, 7 }
  0xcb   : > { %798 = vmatprep.subr.mxu0 %v488_v57  ;;  %869 = vmatprep.subr.mxu1 %v490_v58 }
  0xcc   : > { %799 = vmatpush2.msra.mxu0 %v487_v59  ;;  %870 = vmatpush2.msra.mxu1 %v489_v60  ;;  %v3294_v59 = vsub.s32 3, %v3287_v55  ;;  %v3297_v60 = vsub.s32 7, %v3287_v55 }
  0xcd   : > { %800 = vmatprep.subr.mxu0 %v480_v61  ;;  %871 = vmatprep.subr.mxu1 %v482_v62  ;;  %v3302_v61 = vld [vmem:[%s4062_s4] sm:$0xff] }
  0xce   : > { %801 = vmatpush2.msra.mxu0 %v479_v0  ;;  %872 = vmatpush2.msra.mxu1 %v481_v1  ;;  %v2496_v1 = vld [vmem:[%s4065_s7] sm:$0xff] }
  0xcf   : > { %2823 = vset.pattern.permute.xlu0 %v4073_v6  ;;  %802 = vmatprep.subr.mxu0 %v472_v2  ;;  %v2664_v2 = vrot.slane %v3302_v61, 9 }
  0xd0   : > { %873 = vmatprep.subr.mxu1 %v474_v3  ;;  %885 = vperm.xlu0 %2823, %v882_v4   ;;  %v3312_v3 = vand.u32 127, %v938_v51  ;;  %v1604_v4 = vrot.slane %v3302_v61, %v3294_v59  ;;  %v3382_v51 = vld [vmem:[%s4062_s4 + $0x8] sm:$0xff] }
  0xd1   : > { %803 = vmatpush2.msra.mxu0 %v471_v5  ;;  %804 = vmatprep.mubr.f32.mxu0 %v3164_v63  ;;  %v1608_v5 = vrot.slane %v3302_v61, %v3297_v60 }
  0xd2   : > { %874 = vmatpush2.msra.mxu1 %v473_v7  ;;  %875 = vmatprep.mubr.f32.mxu1 %v3164_v63  ;;  %v2632_v7 = vrot.slane %v3302_v61, 10  ;;  %vm1592_vm0 = vcmp.lt.s32.totalorder %v3312_v3, 127  ;;  %vm1737_vm1 = vcmp.lt.s32.totalorder %v3312_v3, 97  ;;  %vm2043_vm2 = vcmp.lt.s32.totalorder %v3312_v3, 95 }
  0xd3   : > { %805 = vmatmul.mubr.f32.vlgmr.msra.gmra.mxu0 %v3160_v56  ;;  %876 = vmatmul.mubr.f32.vlgmr.msra.gmra.mxu1 %v3160_v56  ;;  %vm1898_vm3 = vcmp.lt.s32.totalorder %v3312_v3, 96  ;;  %vm1411_vm4 = vcmp.lt.s32.totalorder %v3312_v3, 1  ;;  %vm1250_vm6 = vcmp.lt.s32.totalorder %v3312_v3, 31  ;;  %vm1105_vm7 = vcmp.lt.s32.totalorder %v3312_v3, 32 }
  0xd4   : > { %899 = vperm.xlu0 %2823, %v896_v8   ;;  %2391 = vmatprep.mubr.bf16.mxu1 %v4073_v6  ;;  %vm940_vm8 = vcmp.lt.s32.totalorder %v3312_v3, 33 }
  0xd5   : > { %2350 = vmatprep.mubr.bf16.mxu0 %v4073_v6  ;;  %2824 = vset.pattern.permute.xlu1 %v4073_v6 }
 0x14b   : > { %v3184_v9 = vpop.permute.xlu0 %885 }
 0x14f   : > { %v3186_v12 = vpop.permute.xlu0 %899 }
 0x150   : > { %v664_v10 = vpop.f32.mrf.mxu0  ;;  %v735_v11 = vpop.f32.mrf.mxu1 }
 0x151   : > { %v888_v13 = vmul.f32 %v3184_v9, %v664_v10  ;;  %v890_v63 = vmul.f32 %v3184_v9, %v735_v11  ;;  %v3324_v10 = vsub.s32 1, %v3287_v55  ;;  %v1758_v11 = vmul.f32 %v2664_v2, %v3302_v61 }
 0x152   : > { %v666_v14 = vpop.f32.mrf.mxu0  ;;  %v737_v15 = vpop.f32.mrf.mxu1 }
 0x153   : > { %v902_v56 = vadd.f32 %v3186_v12, %v888_v13  ;;  %v904_v16 = vadd.f32 %v3186_v12, %v890_v63  ;;  %v889_v17 = vmul.f32 %v3184_v9, %v666_v14  ;;  %v891_v18 = vmul.f32 %v3184_v9, %v737_v15 }
 0x154   : > { %v1644_v13 = vrot.slane %v1604_v4, %v3294_v59  ;;  %v1648_v63 = vrot.slane %v1608_v5, %v3294_v59  ;;  %v3334_v14 = vmul.f32 %v2632_v7, %v3302_v61  ;;  %v3389_v5 = vsub.s32 6, %v3287_v55 }
 0x155   : > { %v910_v19 = vmax.f32 %v902_v56, 0.0  ;;  %v912_v20 = vmax.f32 %v904_v16, 0.0  ;;  %v903_v21 = vadd.f32 %v3186_v12, %v889_v17  ;;  %v905_v22 = vadd.f32 %v3186_v12, %v891_v18 }
 0x156   : > { %v1769_v18 = vrot.slane %v1758_v11, %v3324_v10  ;;  %v2645_v7 = vrot.slane %v3382_v51, 11 }
 0x157   : > { %v911_v23 = vmax.f32 %v903_v21, 0.0  ;;  %v913_v24 = vmax.f32 %v905_v22, 0.0  ;;  %2031 = vrot.lane.b32.xlu0 %v912_v20, %s2984_s18  ;;  %2027 = vrot.lane.b32.xlu1 %v910_v19, %s2984_s18  ;;  %v2055_v22 = vrot.slane %v3334_v14, %v3324_v10 }
 0x159   : > { %v2734_v25 = vpack.c.bf16 %v911_v23, %v910_v19  ;;  %v2735_v26 = vpack.c.bf16 %v913_v24, %v912_v20 }
 0x15b   : > { %1882 = vrot.lane.b32.xlu0 %v910_v19, %s2985_s19  ;;  %1576 = vrot.lane.b32.xlu1 %v910_v19, %s2986_s21  ;;  %1572 = vst [vmem:[#allocation2 + $0x8] sm:$0x33] %v2734_v25  ;;  %1573 = vst [vmem:[#allocation2 + $0x88] sm:$0x33] %v2735_v26 }
 0x15f   : > { %1886 = vrot.lane.b32.xlu0 %v912_v20, %s2985_s19  ;;  %1580 = vrot.lane.b32.xlu1 %v912_v20, %s2986_s21 }
 0x163   : > { %1089 = vrot.lane.b32.xlu0 %v910_v19, %s2987_s14  ;;  %1721 = vrot.lane.b32.xlu1 %v910_v19, %s2988_s16 }
 0x167   : > { %1093 = vrot.lane.b32.xlu0 %v912_v20, %s2987_s14  ;;  %1725 = vrot.lane.b32.xlu1 %v912_v20, %s2988_s16 }
 0x16b   : > { %922 = vrot.lane.b32.xlu0 %v910_v19, %s2989_s20  ;;  %1395 = vrot.lane.b32.xlu1 %v910_v19, %s2990_s15 }
 0x16f   : > { %926 = vrot.lane.b32.xlu0 %v912_v20, %s2989_s20  ;;  %1399 = vrot.lane.b32.xlu1 %v912_v20, %s2990_s15 }
 0x173   : > { %1234 = vrot.lane.b32.xlu1 %v910_v19, %s2991_s10  ;;  %1578 = vrot.lane.b32.xlu0 %v911_v23, %s2986_s21 }
 0x177   : > { %1238 = vrot.lane.b32.xlu1 %v912_v20, %s2991_s10  ;;  %1582 = vrot.lane.b32.xlu0 %v913_v24, %s2986_s21 }
 0x17b   : > { %1723 = vrot.lane.b32.xlu0 %v911_v23, %s2988_s16  ;;  %2029 = vrot.lane.b32.xlu1 %v911_v23, %s2984_s18 }
 0x17f   : > { %1727 = vrot.lane.b32.xlu0 %v913_v24, %s2988_s16  ;;  %2033 = vrot.lane.b32.xlu1 %v913_v24, %s2984_s18 }
 0x183   : > { %1397 = vrot.lane.b32.xlu0 %v911_v23, %s2990_s15  ;;  %1884 = vrot.lane.b32.xlu1 %v911_v23, %s2985_s19 }
 0x187   : > { %1401 = vrot.lane.b32.xlu0 %v913_v24, %s2990_s15  ;;  %1888 = vrot.lane.b32.xlu1 %v913_v24, %s2985_s19 }
 0x18b   : > { %1236 = vrot.lane.b32.xlu0 %v911_v23, %s2991_s10  ;;  %1091 = vrot.lane.b32.xlu1 %v911_v23, %s2987_s14 }
 0x18f   : > { %1240 = vrot.lane.b32.xlu0 %v913_v24, %s2991_s10  ;;  %1095 = vrot.lane.b32.xlu1 %v913_v24, %s2987_s14 }
 0x193   : > { %v806_v27 = vpop.f32.mrf.mxu0  ;;  %v877_v28 = vpop.f32.mrf.mxu1  ;;  %924 = vrot.lane.b32.xlu1 %v911_v23, %s2989_s20 }
 0x194   : > { %v892_v29 = vmul.f32 %v3184_v9, %v806_v27  ;;  %v894_v30 = vmul.f32 %v3184_v9, %v877_v28  ;;  %v1809_v27 = vrot.slane %v1769_v18, %v3324_v10 }
 0x195   : > { %v808_v31 = vpop.f32.mrf.mxu0  ;;  %v879_v32 = vpop.f32.mrf.mxu1 }
 0x196   : > { %v906_v33 = vadd.f32 %v3186_v12, %v892_v29  ;;  %v908_v34 = vadd.f32 %v3186_v12, %v894_v30  ;;  %v893_v35 = vmul.f32 %v3184_v9, %v808_v31  ;;  %v895_v36 = vmul.f32 %v3184_v9, %v879_v32 }
 0x197   : > { %928 = vrot.lane.b32.xlu1 %v913_v24, %s2989_s20  ;;  %v2095_v30 = vrot.slane %v2055_v22, %v3324_v10 }
 0x198   : > { %v914_v37 = vmax.f32 %v906_v33, 0.0  ;;  %v907_v38 = vadd.f32 %v3186_v12, %v893_v35  ;;  %v909_v39 = vadd.f32 %v3186_v12, %v895_v36  ;;  %v916_v40 = vmax.f32 %v908_v34, 0.0 }
 0x199   : > { %v3328_v12 = vsub.s32 5, %v3287_v55  ;;  %v3361_v34 = vsub.s32 2, %v3287_v55  ;;  %v1910_v35 = vrot.slane %v3302_v61, %v3324_v10 }
 0x19a   : > { %v915_v41 = vmax.f32 %v907_v38, 0.0  ;;  %v917_v42 = vmax.f32 %v909_v39, 0.0  ;;  %2035 = vrot.lane.b32.xlu0 %v914_v37, %s2984_s18 }
 0x19b   : > { %1584 = vrot.lane.b32.xlu1 %v914_v37, %s2986_s21  ;;  %v1773_v19 = vrot.slane %v1758_v11, %v3328_v12  ;;  %v2059_v23 = vrot.slane %v3334_v14, %v3328_v12  ;;  %v1914_v36 = vrot.slane %v3302_v61, %v3328_v12  ;;  %v1431_v11 = vrot.slane %v3382_v51, %v3361_v34 }
 0x19c   : > { %v2736_v43 = vpack.c.bf16 %v915_v41, %v914_v37  ;;  %v2737_v44 = vpack.c.bf16 %v917_v42, %v916_v40 }
 0x19d   : > { %v1813_v28 = vrot.slane %v1773_v19, %v3324_v10  ;;  %v2099_v31 = vrot.slane %v2059_v23, %v3324_v10  ;;  %v1272_v19 = vmul.f32 %v2645_v7, %v3382_v51  ;;  %v1471_v22 = vrot.slane %v1431_v11, %v3361_v34 }
 0x19e   : > { %1890 = vrot.lane.b32.xlu0 %v914_v37, %s2985_s19  ;;  %1574 = vst [vmem:[#allocation2 + $0x28] sm:$0x33] %v2736_v43  ;;  %1575 = vst [vmem:[#allocation2 + $0x40] sm:$0x33] %v2737_v44  ;;  %v2665_v7 = vrot.slane %v3382_v51, 9 }
 0x19f   : > { %1729 = vrot.lane.b32.xlu1 %v914_v37, %s2988_s16 }
 0x1a2   : > { %1588 = vrot.lane.b32.xlu0 %v916_v40, %s2986_s21 }
 0x1a3   : > { %2039 = vrot.lane.b32.xlu1 %v916_v40, %s2984_s18 }
 0x1a6   : > { %1733 = vrot.lane.b32.xlu0 %v916_v40, %s2988_s16 }
 0x1a7   : > { %1894 = vrot.lane.b32.xlu1 %v916_v40, %s2985_s19 }
 0x1aa   : > { %1097 = vrot.lane.b32.xlu0 %v914_v37, %s2987_s14 }
 0x1ab   : > { %1403 = vrot.lane.b32.xlu1 %v914_v37, %s2990_s15 }
 0x1ae   : > { %1101 = vrot.lane.b32.xlu0 %v916_v40, %s2987_s14 }
 0x1af   : > { %1407 = vrot.lane.b32.xlu1 %v916_v40, %s2990_s15 }
 0x1b2   : > { %930 = vrot.lane.b32.xlu0 %v914_v37, %s2989_s20 }
 0x1b3   : > { %1242 = vrot.lane.b32.xlu1 %v914_v37, %s2991_s10 }
 0x1b6   : > { %934 = vrot.lane.b32.xlu0 %v916_v40, %s2989_s20 }
 0x1b7   : > { %1409 = vrot.lane.b32.xlu1 %v917_v42, %s2990_s15 }
 0x1ba   : > { %1103 = vrot.lane.b32.xlu0 %v917_v42, %s2987_s14 }
 0x1bb   : > { %1248 = vrot.lane.b32.xlu1 %v917_v42, %s2991_s10 }
 0x1be   : > { %936 = vrot.lane.b32.xlu0 %v917_v42, %s2989_s20 }
 0x1bf   : > { %1586 = vrot.lane.b32.xlu1 %v915_v41, %s2986_s21 }
 0x1c2   : > { %2037 = vrot.lane.b32.xlu0 %v915_v41, %s2984_s18 }
 0x1c3   : > { %1590 = vrot.lane.b32.xlu1 %v917_v42, %s2986_s21 }
 0x1c6   : > { %2041 = vrot.lane.b32.xlu0 %v917_v42, %s2984_s18 }
 0x1c7   : > { %1731 = vrot.lane.b32.xlu1 %v915_v41, %s2988_s16 }
 0x1c9   : > { %v3260_v45 = vpop.permute.xlu0 %2031  ;;  %v3262_v46 = vpop.permute.xlu1 %2027 }
 0x1ca   : > { %1892 = vrot.lane.b32.xlu0 %v915_v41, %s2985_s19 }
 0x1cb   : > { %1735 = vrot.lane.b32.xlu1 %v917_v42, %s2988_s16 }
 0x1cd   : > { %v3266_v47 = vpop.permute.xlu0 %1882  ;;  %v3268_v48 = vpop.permute.xlu1 %1576 }
 0x1ce   : > { %4104 = vst [vmem:[#allocation14_spill] sm:$0xff] %v3266_v47  ;;  %1896 = vrot.lane.b32.xlu0 %v917_v42, %s2985_s19  ;;  %s2913_s19 = sshll.u32 %s2992_s9, 4  ;;  %s2914_s19 = int_to_ptr.vmem [resolvable:$false] %s2913_s19 }
 0x1cf   : > { %1099 = vrot.lane.b32.xlu1 %v915_v41, %s2987_s14  ;;  %s2915_s21 = scalar_lea.vmem %s2914_s19, 2048 }
 0x1d1   : > { %v3272_v49 = vpop.permute.xlu0 %1886  ;;  %v3274_v50 = vpop.permute.xlu1 %1580 }
 0x1d2   : > { %1405 = vrot.lane.b32.xlu0 %v915_v41, %s2990_s15 }
 0x1d3   : > { %932 = vrot.lane.b32.xlu1 %v915_v41, %s2989_s20 }
 0x1d5   : > { %v3278_v52 = vpop.permute.xlu0 %1089  ;;  %v3280_v53 = vpop.permute.xlu1 %1721 }
 0x1d6   : > { %4105 = vst [vmem:[#allocation15_spill] sm:$0xff] %v3280_v53  ;;  %1244 = vrot.lane.b32.xlu0 %v915_v41, %s2991_s10 }
 0x1d7   : > { %1246 = vrot.lane.b32.xlu1 %v916_v40, %s2991_s10  ;;  %s2631_s10 = sshll.u32 %s3145_s22, 6 }
 0x1d8   : > { %s4012_s17 = scalar_lea.vmem [#allocation8], %s2631_s10 }
 0x1d9   : > { %v3289_v57 = vpop.permute.xlu0 %1093  ;;  %v3291_v58 = vpop.permute.xlu1 %1725  ;;  %s2541_s1 = sshll.u32 %s4012_s17, 4  ;;  %s2542_s1 = int_to_ptr.vmem [resolvable:$true] %s2541_s1 }
 0x1da   : > { %2485 = vperm.xlu0 %2823, %v2482_v54   ;;  %s2909_s18 = scalar_lea.vmem %s2542_s1, 1024  ;;  %p2916_p10 = scmp.lt.s32.totalorder %s2542_s1, %s2914_s19 }
 0x1db   : > { %2499 = vperm.xlu1 %2824, %v2496_v1   ;;  %p2910_p8 = scmp.ne.s32.totalorder %s2542_s1, %s2909_s18  ;;  %p2917_p2 = scmp.lt.s32.totalorder %s2915_s21, %s2909_s18 }
 0x1dd   : > { %v3304_v62 = vpop.permute.xlu0 %922  ;;  %v3306_v0 = vpop.permute.xlu1 %1395  ;;  %p2911_p11 = pnand %p2910_p8, %p4143_p3  ;;  %p2918_p13 = por %p2917_p2, %p2916_p10 }
 0x1df   : > { %p2912_p7 = pneg %p2911_p11 }
 0x1e1   : > { %v3319_v8 = vpop.permute.xlu0 %926  ;;  %v3321_v9 = vpop.permute.xlu1 %1399  ;;  %p2919_p0 = pnand %p2918_p13, %p2912_p7 }
 0x1e5   : > { %v3336_v15 = vpop.permute.xlu1 %1234  ;;  %v1579_v56 = vpop.permute.xlu0 %1578 }
 0x1e6   : > { %v1598_v16 = vsel %vm1592_vm0, %v1579_v56, %v3274_v50  ;;  %v1599_v17 = vsel %vm1592_vm0, %v3268_v48, %v1579_v56  ;;  %v1435_v56 = vrot.slane %v3382_v51, %v3389_v5 }
 0x1e7   : > { %v1673_v20 = vmul.f32 %v1644_v13, %v1599_v17  ;;  %v1674_v21 = vmul.f32 %v1648_v63, %v1598_v16  ;;  %v1950_v13 = vrot.slane %v1910_v35, %v3324_v10  ;;  %v1954_v63 = vrot.slane %v1914_v36, %v3324_v10 }
 0x1e8   : > { %v3400_v16 = vsub.s32 0, %v3287_v55 }
 0x1e9   : > { %v2738_v24 = vpack.c.bf16 %v1674_v21, %v1673_v20  ;;  %v3350_v25 = vpop.permute.xlu1 %1238  ;;  %v3352_v26 = vpop.permute.xlu0 %1582 }
 0x1ea   : > { %v1125_v35 = vrot.slane %v3382_v51, %v3400_v16 }
 0x1eb   : > { %v1709_v29 = vrot.slane %v2738_v24, 6 }
 0x1ed   : > { %1717 = vst [vmem:[#allocation2 + $0x8] sm:$0xcc] %v1709_v29  ;;  %v1724_v32 = vpop.permute.xlu0 %1723  ;;  %v2030_v33 = vpop.permute.xlu1 %2029  ;;  %v3419_v29 = vsub.s32 4, %v3287_v55 }
 0x1ee   : > { %v1743_v37 = vsel %vm1737_vm1, %v1724_v32, %v3291_v58  ;;  %v1744_v38 = vsel %vm1737_vm1, %v3280_v53, %v1724_v32  ;;  %v2049_v39 = vsel %vm2043_vm2, %v2030_v33, %v3260_v45  ;;  %v2050_v40 = vsel %vm2043_vm2, %v3262_v46, %v2030_v33 }
 0x1ef   : > { %v1838_v41 = vmul.f32 %v1809_v27, %v1744_v38  ;;  %v1839_v42 = vmul.f32 %v1813_v28, %v1743_v37  ;;  %v2124_v43 = vmul.f32 %v2095_v30, %v2050_v40  ;;  %v2125_v44 = vmul.f32 %v2099_v31, %v2049_v39 }
 0x1f0   : > { %v1475_v27 = vrot.slane %v1435_v56, %v3361_v34  ;;  %v1290_v33 = vrot.slane %v1272_v19, %v3400_v16  ;;  %v1294_v55 = vrot.slane %v1272_v19, %v3419_v29  ;;  %v1129_v38 = vrot.slane %v3382_v51, %v3419_v29 }
 0x1f1   : > { %v2742_v54 = vpack.c.bf16 %v1839_v42, %v1838_v41  ;;  %v2750_v1 = vpack.c.bf16 %v2125_v44, %v2124_v43  ;;  %v3384_v2 = vpop.permute.xlu0 %1727  ;;  %v3386_v4 = vpop.permute.xlu1 %2033  ;;  %v2633_v43 = vrot.slane %v3382_v51, 10 }
 0x1f2   : > { %v1330_v11 = vrot.slane %v1290_v33, %v3400_v16  ;;  %v1334_v56 = vrot.slane %v1294_v55, %v3400_v16 }
 0x1f3   : > { %1878 = vst [vmem:[#allocation2 + $0x58] sm:$0x33] %v2742_v54  ;;  %2164 = vst [vmem:[#allocation2 + $0x20] sm:$0x33] %v2750_v1  ;;  %v966_v19 = vmul.f32 %v2633_v43, %v3382_v51 }
 0x1f5   : > { %v3403_v17 = vpop.permute.xlu0 %1397  ;;  %v1885_v18 = vpop.permute.xlu1 %1884  ;;  %v988_v33 = vrot.slane %v966_v19, %v3419_v29 }
 0x1f6   : > { %v1904_v20 = vsel %vm1898_vm3, %v1885_v18, %v3272_v49  ;;  %v1905_v21 = vsel %vm1898_vm3, %v3266_v47, %v1885_v18  ;;  %v1417_v28 = vsel %vm1411_vm4, %v3403_v17, %v3321_v9  ;;  %v1169_v18 = vrot.slane %v1129_v38, %v3400_v16 }
 0x1f7   : > { %v1979_v23 = vmul.f32 %v1950_v13, %v1905_v21  ;;  %v1980_v24 = vmul.f32 %v1954_v63, %v1904_v20  ;;  %v1494_v39 = vmul.f32 %v1471_v22, %v1417_v28  ;;  %v1165_v63 = vrot.slane %v1125_v35, %v3400_v16 }
 0x1f8   : > { %v1612_v38 = vrot.slane %v3382_v51, %v3294_v59 }
 0x1f9   : > { %v2746_v30 = vpack.c.bf16 %v1980_v24, %v1979_v23  ;;  %v3421_v31 = vpop.permute.xlu0 %1401  ;;  %v3423_v32 = vpop.permute.xlu1 %1888 }
 0x1fa   : > { %v1416_v36 = vsel %vm1411_vm4, %v3321_v9, %v3421_v31  ;;  %v2185_v37 = vld [vmem:[#allocation2 + $0x20] sm:$0x33] }
 0x1fb   : > { %v2015_v40 = vrot.slane %v2746_v30, 6  ;;  %v1495_v41 = vmul.f32 %v1475_v27, %v1416_v36  ;;  %v2697_v42 = vcombine.high %v2185_v37, %v2185_v37  ;;  %v2696_v44 = vcombine.low %v2185_v37, %v2185_v37 }
 0x1fc   : > { %v984_v30 = vrot.slane %v966_v19, %v3400_v16 }
 0x1fd   : > { %2023 = vst [vmem:[#allocation2 + $0x58] sm:$0xcc] %v2015_v40  ;;  %v2731_v54 = vpack.c.bf16 %v1495_v41, %v1494_v39  ;;  %v3437_v1 = vpop.permute.xlu0 %1236  ;;  %2704 = vmatprep.subr.msk.bf16.mxu0 %vm2293_vm5, %v2697_v42  ;;  %v3441_v9 = vpop.permute.xlu1 %1091  ;;  %v2295_v22 = vsel %vm2293_vm5, %v2696_v44, 0  ;;  %v1759_v39 = vmul.f32 %v2665_v7, %v3382_v51  ;;  %v2063_v41 = vrot.slane %v966_v19, %v3324_v10 }
 0x1fe   : > { %v1256_v20 = vsel %vm1250_vm6, %v3437_v1, %v3350_v25  ;;  %v1111_v21 = vsel %vm1105_vm7, %v3441_v9, %v3289_v57  ;;  %2329 = vmatpush1.bf16.msra.mxu0 %v2295_v22  ;;  %v2067_v44 = vrot.slane %v966_v19, %v3328_v12  ;;  %v1024_v7 = vrot.slane %v984_v30, %v3400_v16 }
 0x1ff   : > { %v1529_v13 = vrot.slane %v2731_v54, 6  ;;  %v1353_v35 = vmul.f32 %v1330_v11, %v1256_v20  ;;  %v1188_v36 = vmul.f32 %v1165_v63, %v1111_v21  ;;  %v1616_v54 = vrot.slane %v3382_v51, %v3297_v60 }
 0x200   : > { %v1777_v63 = vrot.slane %v1759_v39, %v3324_v10  ;;  %v2103_v19 = vrot.slane %v2063_v41, %v3324_v10  ;;  %v1918_v20 = vrot.slane %v3382_v51, %v3324_v10  ;;  %v1922_v30 = vrot.slane %v3382_v51, %v3328_v12 }
 0x201   : > { %1537 = vst [vmem:[#allocation2 + $0x68] sm:$0xcc] %v1529_v13  ;;  %v3458_v23 = vpop.permute.xlu0 %1240  ;;  %v3460_v24 = vpop.permute.xlu1 %1095  ;;  %v1028_v13 = vrot.slane %v988_v33, %v3400_v16  ;;  %v2048_v33 = vsel %vm2043_vm2, %v3260_v45, %v3386_v4 }
 0x202   : > { %4106 = vst [vmem:[#allocation16_spill] sm:$0xff] %v3458_v23  ;;  %v1255_v27 = vsel %vm1250_vm6, %v3350_v25, %v3458_v23  ;;  %v1110_v28 = vsel %vm1105_vm7, %v3289_v57, %v3460_v24  ;;  %v1958_v51 = vrot.slane %v1918_v20, %v3324_v10  ;;  %v2126_v41 = vmul.f32 %v2103_v19, %v2048_v33 }
 0x203   : > { %v1354_v37 = vmul.f32 %v1334_v56, %v1255_v27  ;;  %v1189_v55 = vmul.f32 %v1169_v18, %v1110_v28  ;;  %v1652_v18 = vrot.slane %v1612_v38, %v3294_v59  ;;  %v2107_v27 = vrot.slane %v2067_v44, %v3324_v10 }
 0x204   : > { %v2828_v40 = vld [vmem:[#allocation2 + $0x8] ss:$80 sps:$4 sm:$0xff]   ;;  %v2830_v25 = vld [vmem:[#allocation2 + $0xc] ss:$80 sps:$4 sm:$0xff]   ;;  %v1656_v28 = vrot.slane %v1616_v54, %v3294_v59  ;;  %v1903_v54 = vsel %vm1898_vm3, %v3272_v49, %v3423_v32 }
 0x205   : > { %v2727_v42 = vpack.c.bf16 %v1354_v37, %v1353_v35  ;;  %v2723_v43 = vpack.c.bf16 %v1189_v55, %v1188_v36  ;;  %v3477_v57 = vpop.permute.xlu1 %924  ;;  %2330 = vmatprep.subr.bf16.mxu0 %v2830_v25  ;;  %v1781_v37 = vrot.slane %v1759_v39, %v3328_v12  ;;  %v1817_v55 = vrot.slane %v1777_v63, %v3324_v10 }
 0x206   : > { %2331 = vmatpush1.bf16.msra.mxu0 %v2828_v40  ;;  %v946_v56 = vsel %vm940_vm8, %v3477_v57, %v3319_v8  ;;  %v2644_v40 = vrot.slane %v3302_v61, 11  ;;  %v1981_v49 = vmul.f32 %v1958_v51, %v1903_v54 }
 0x207   : > { %1392 = vst [vmem:[#allocation2 + $0x68] sm:$0x33] %v2727_v42  ;;  %v1223_v11 = vrot.slane %v2723_v43, 6  ;;  %v1047_v35 = vmul.f32 %v1024_v7, %v946_v56  ;;  %v1962_v43 = vrot.slane %v1922_v30, %v3324_v10  ;;  %v1742_v7 = vsel %vm1737_vm1, %v3291_v58, %v3384_v2 }
 0x208   : > { %v3546_v19 = vmul.f32 %v2644_v40, %v3302_v61 }
 0x209   : > { %1231 = vst [vmem:[#allocation2 + $0x38] sm:$0xcc] %v1223_v11  ;;  %v3493_v21 = vpop.permute.xlu1 %928 }
 0x20a   : > { %4107 = vst [vmem:[#allocation17_spill] sm:$0xff] %v3493_v21  ;;  %v945_v22 = vsel %vm940_vm8, %v3319_v8, %v3493_v21  ;;  %v1597_v8 = vsel %vm1592_vm0, %v3274_v50, %v3352_v26  ;;  %v1286_v40 = vrot.slane %v3546_v19, %v3419_v29 }
 0x20b   : > { %v1048_v36 = vmul.f32 %v1028_v13, %v945_v22  ;;  %v1675_v44 = vmul.f32 %v1652_v18, %v1597_v8  ;;  %v3555_v22 = vld [vmem:[%s4062_s4 + $0x10] sm:$0xff] }
 0x20c   : > { %v3513_v38 = vpop.permute.xlu0 %2035  ;;  %v2634_v30 = vrot.slane %v3555_v22, 10 }
 0x20d   : > { %v2719_v25 = vpack.c.bf16 %v1048_v36, %v1047_v35  ;;  %v2047_v45 = vsel %vm2043_vm2, %v3386_v4, %v3513_v38  ;;  %v3521_v39 = vpop.permute.xlu1 %1584  ;;  %v1821_v4 = vrot.slane %v1781_v37, %v3324_v10  ;;  %v2646_v36 = vrot.slane %v3555_v22, 11 }
 0x20e   : > { %v2127_v42 = vmul.f32 %v2107_v27, %v2047_v45  ;;  %v1596_v50 = vsel %vm1592_vm0, %v3352_v26, %v3521_v39  ;;  %v1840_v27 = vmul.f32 %v1817_v55, %v1742_v7  ;;  %v1427_v55 = vrot.slane %v3302_v61, %v3389_v5 }
 0x20f   : > { %1086 = vst [vmem:[#allocation2 + $0x38] sm:$0x33] %v2719_v25  ;;  %v1676_v11 = vmul.f32 %v1656_v28, %v1596_v50  ;;  %v3573_v25 = vmul.f32 %v2634_v30, %v3555_v22  ;;  %v1121_v50 = vrot.slane %v3302_v61, %v3419_v29 }
 0x210   : > { %v2751_v13 = vpack.c.bf16 %v2127_v42, %v2126_v41  ;;  %v3537_v63 = vpop.permute.xlu0 %1890  ;;  %v3578_v41 = vmul.f32 %v2646_v36, %v3555_v22  ;;  %v3586_v54 = vrot.slane %v1427_v55, %v3361_v34  ;;  %v2666_v55 = vrot.slane %v3555_v22, 9 }
 0x211   : > { %4108 = vst [vmem:[#allocation18_spill] sm:$0xff] %v3537_v63  ;;  %v2739_v26 = vpack.c.bf16 %v1676_v11, %v1675_v44  ;;  %v1902_v56 = vsel %vm1898_vm3, %v3423_v32, %v3537_v63  ;;  %v3543_v18 = vpop.permute.xlu1 %1729  ;;  %v980_v11 = vrot.slane %v3334_v14, %v3419_v29  ;;  %v3611_v30 = vrot.slane %v1121_v50, %v3400_v16 }
 0x212   : > { %4109 = vst [vmem:[#allocation19_spill] sm:$0xff] %v3543_v18  ;;  %2165 = vst [vmem:[#allocation2 + $0x48] sm:$0x33] %v2751_v13  ;;  %v1982_v20 = vmul.f32 %v1962_v43, %v1902_v56  ;;  %v1741_v58 = vsel %vm1737_vm1, %v3384_v2, %v3543_v18  ;;  %v3566_v2 = vld [vmem:[%s4062_s4 + $0x18] sm:$0xff]  ;;  %v3591_v13 = vrot.slane %v1286_v40, %v3400_v16 }
 0x213   : > { %v1710_v32 = vrot.slane %v2739_v26, 6  ;;  %v1841_v28 = vmul.f32 %v1821_v4, %v1741_v58  ;;  %v2635_v42 = vrot.slane %v3566_v2, 10  ;;  %v1133_v26 = vrot.slane %v3555_v22, %v3400_v16 }
 0x214   : > { %v2747_v33 = vpack.c.bf16 %v1982_v20, %v1981_v49  ;;  %v3558_v35 = vpop.permute.xlu0 %1588  ;;  %v1439_v56 = vrot.slane %v3555_v22, %v3361_v34  ;;  %v992_v49 = vrot.slane %v3573_v25, %v3400_v16  ;;  %v1451_v36 = vrot.slane %v3566_v2, %v3389_v5 }
 0x215   : > { %1718 = vst [vmem:[#allocation2 + $0x88] sm:$0xcc] %v1710_v32  ;;  %v2743_v37 = vpack.c.bf16 %v1841_v28, %v1840_v27  ;;  %v3561_v8 = vpop.permute.xlu1 %2039  ;;  %v1298_v27 = vrot.slane %v3578_v41, %v3400_v16  ;;  %v1423_v32 = vrot.slane %v3302_v61, %v3361_v34  ;;  %v3608_v28 = vmul.f32 %v2635_v42, %v3566_v2 }
 0x216   : > { %v2016_v51 = vrot.slane %v2747_v33, 6  ;;  %v1145_v40 = vrot.slane %v3566_v2, %v3419_v29  ;;  %v1282_v42 = vrot.slane %v3546_v19, %v3400_v16  ;;  %v2667_v50 = vrot.slane %v3566_v2, 9 }
 0x217   : > { %1879 = vst [vmem:[#allocation2 + $0x10] sm:$0x33] %v2743_v37  ;;  %v1117_v37 = vrot.slane %v3302_v61, %v3400_v16  ;;  %v3642_v19 = vrot.slane %v1298_v27, %v3400_v16  ;;  %v1463_v47 = vrot.slane %v1423_v32, %v3361_v34  ;;  %v1760_v27 = vmul.f32 %v2666_v55, %v3555_v22 }
 0x218   : > { %2024 = vst [vmem:[#allocation2 + $0x10] sm:$0xcc] %v2016_v51  ;;  %v3575_v45 = vpop.permute.xlu0 %1733  ;;  %v3621_v51 = vrot.slane %v980_v11, %v3400_v16  ;;  %v976_v11 = vrot.slane %v3334_v14, %v3400_v16  ;;  %v3659_v32 = vrot.slane %v1145_v40, %v3400_v16  ;;  %v2075_v55 = vrot.slane %v3573_v25, %v3328_v12 }
 0x219   : > { %v3583_v43 = vpop.permute.xlu1 %1894  ;;  %v2186_v44 = vld [vmem:[#allocation2 + $0x48] sm:$0x33]  ;;  %4114 = vst [vmem:[#allocation24_spill] sm:$0xff] %v3642_v19  ;;  %v3655_v14 = vrot.slane %v1117_v37, %v3400_v16  ;;  %v1761_v19 = vmul.f32 %v2667_v50, %v3566_v2  ;;  %v2071_v37 = vrot.slane %v3573_v25, %v3324_v10  ;;  %v1628_v40 = vrot.slane %v3566_v2, %v3294_v59 }
 0x21a   : > { %4110 = vst [vmem:[#allocation20_spill] sm:$0xff] %v3583_v43  ;;  %v2699_v4 = vcombine.high %v2186_v44, %v2186_v44  ;;  %v2698_v7 = vcombine.low %v2186_v44, %v2186_v44  ;;  %v3629_v44 = vrot.slane %v1133_v26, %v3400_v16  ;;  %v1004_v26 = vrot.slane %v3608_v28, %v3419_v29 }
 0x21b   : > { %4117 = vst [vmem:[#allocation27_spill] sm:$0xff] %v3659_v32  ;;  %v1785_v63 = vrot.slane %v1760_v27, %v3324_v10  ;;  %v1789_v43 = vrot.slane %v1760_v27, %v3328_v12  ;;  %v1797_v23 = vrot.slane %v1761_v19, %v3328_v12  ;;  %v3712_v21 = vrot.slane %v2075_v55, %v3324_v10 }
 0x21c   : > { %2706 = vmatprep.subr.msk.bf16.mxu1 %vm2293_vm5, %v2699_v4  ;;  %v3600_v20 = vpop.permute.xlu0 %1097  ;;  %v2301_v58 = vsel %vm2293_vm5, %v2698_v7, 0  ;;  %v3632_v4 = vrot.slane %v1439_v56, %v3361_v34  ;;  %v1620_v56 = vrot.slane %v3555_v22, %v3294_v59  ;;  %v3679_v32 = vrot.slane %v1004_v26, %v3400_v16 }
 0x21d   : > { %2370 = vmatpush1.bf16.msra.mxu1 %v2301_v58  ;;  %v3613_v33 = vpop.permute.xlu1 %1403  ;;  %v3635_v58 = vrot.slane %v992_v49, %v3400_v16  ;;  %v2838_v49 = vld [vmem:[#allocation2 + $0x3c] ss:$48 sps:$4 sm:$0xff]   ;;  %v1926_v26 = vrot.slane %v3555_v22, %v3324_v10  ;;  %v1418_v27 = vsel %vm1411_vm4, %v3306_v0, %v3403_v17  ;;  %v1938_v55 = vrot.slane %v3566_v2, %v3328_v12 }
 0x21e   : > { %4111 = vst [vmem:[#allocation21_spill] sm:$0xff] %v3632_v4  ;;  %4119 = vst [vmem:[#allocation29_spill] sm:$0xff] %v3679_v32  ;;  %v3682_v50 = vrot.slane %v1620_v56, %v3294_v59  ;;  %v2083_v4 = vrot.slane %v3608_v28, %v3328_v12  ;;  %v1930_v56 = vrot.slane %v3555_v22, %v3328_v12 }
 0x21f   : > { %v2833_v61 = vld [vmem:[#allocation2 + $0x88] ss:$-120 sps:$4 sm:$0xff]   ;;  %v2835_v7 = vld [vmem:[#allocation2 + $0x8c] ss:$-120 sps:$4 sm:$0xff]   ;;  %4112 = vst [vmem:[#allocation22_spill] sm:$0xff] %v3635_v58  ;;  %v3652_v58 = vrot.slane %v1451_v36, %v3361_v34  ;;  %v3668_v36 = vrot.slane %v976_v11, %v3400_v16  ;;  %v1632_v11 = vrot.slane %v3566_v2, %v3297_v60  ;;  %v3741_v17 = vrot.slane %v1785_v63, %v3324_v10 }
 0x220   : > { %v3639_v6 = vpop.permute.xlu0 %1101  ;;  %2371 = vmatprep.subr.bf16.mxu1 %v2835_v7  ;;  %v1624_v7 = vrot.slane %v3555_v22, %v3297_v60  ;;  %v3700_v60 = vld [vmem:[%s4063_s5] sm:$0xf]  ;;  %v3738_v18 = vrot.slane %v2083_v4, %v3324_v10  ;;  %v3760_v63 = vrot.slane %v1797_v23, %v3324_v10 }
 0x221   : > { %4113 = vst [vmem:[#allocation23_spill] sm:$0xff] %v3639_v6  ;;  %v3649_v53 = vpop.permute.xlu1 %1407  ;;  %4116 = vst [vmem:[#allocation26_spill] sm:$0xff] %v3652_v58  ;;  %2372 = vmatpush1.bf16.msra.mxu1 %v2833_v61  ;;  %v3662_v6 = vrot.slane %v1282_v42, %v3400_v16  ;;  %v2836_v61 = vld [vmem:[#allocation2 + $0x38] ss:$48 sps:$4 sm:$0xff]  }
 0x222   : > { %4115 = vst [vmem:[#allocation25_spill] sm:$0xff] %v3649_v53  ;;  %2373 = vmatprep.subr.bf16.mxu1 %v2838_v49  ;;  %v2079_v49 = vrot.slane %v3608_v28, %v3324_v10  ;;  %4121 = vst [vmem:[#allocation31_spill] sm:$0xff] %v3700_v60  ;;  %v3703_v32 = vrot.slane %v1624_v7, %v3294_v59  ;;  %v1793_v53 = vrot.slane %v1761_v19, %v3324_v10 }
 0x223   : > { %v3726_v19 = vrot.slane %v1632_v11, %v3294_v59  ;;  %v3747_v11 = vrot.slane %v1930_v56, %v3324_v10  ;;  %v1112_v56 = vsel %vm1105_vm7, %v3278_v52, %v3441_v9  ;;  %v1141_v9 = vrot.slane %v3566_v2, %v3400_v16 }
 0x224   : > { %v3676_v42 = vpop.permute.xlu0 %930  ;;  %v3757_v4 = vrot.slane %v1793_v53, %v3324_v10  ;;  %v1257_v53 = vsel %vm1250_vm6, %v3336_v15, %v3437_v1  ;;  %v1443_v1 = vrot.slane %v3555_v22, %v3389_v5  ;;  %v947_v5 = vsel %vm940_vm8, %v3304_v62, %v3477_v57 }
 0x225   : > { %4118 = vst [vmem:[#allocation28_spill] sm:$0xff] %v3676_v42  ;;  %v3688_v58 = vpop.permute.xlu1 %1242  ;;  %2374 = vmatpush1.bf16.msra.mxu1 %v2836_v61  ;;  %v3715_v61 = vrot.slane %v1628_v40, %v3294_v59  ;;  %v1934_v42 = vrot.slane %v3566_v2, %v3324_v10  ;;  %v3744_v59 = vrot.slane %v1926_v26, %v3324_v10 }
 0x226   : > { %4120 = vst [vmem:[#allocation30_spill] sm:$0xff] %v3688_v58  ;;  %v3709_v58 = vrot.slane %v2071_v37, %v3324_v10  ;;  %v3729_v37 = vrot.slane %v2079_v49, %v3324_v10  ;;  %v3754_v49 = vrot.slane %v1789_v43, %v3324_v10  ;;  %v1493_v26 = vmul.f32 %v3586_v54, %v1418_v27 }
 0x227   : > { %v3778_v43 = vrot.slane %v1938_v55, %v3324_v10  ;;  %v1137_v54 = vrot.slane %v3555_v22, %v3419_v29  ;;  %v1187_v55 = vmul.f32 %v3611_v30, %v1112_v56 }
 0x228   : > { %v3723_v7 = vpop.permute.xlu0 %934  ;;  %2707 = vmatmul.mubr.msk.bf16.vlgmr.msra.gmra.mxu1 %vm2289_vm9, %v3700_v60  ;;  %v4123_v60 = vmov 0  }
 0x229   : > { %4122 = vst [vmem:[#allocation32_spill] sm:$0xff] %v3723_v7  ;;  %v3733_v40 = vpop.permute.xlu1 %1409  ;;  %2473 = vmatprep.mubr.bf16.mxu1 %v4123_v60 }
 0x22a   : > { %v1419_v12 = vsel %vm1411_vm4, %v3733_v40, %v3306_v0  ;;  %v3769_v0 = vrot.slane %v1934_v42, %v3324_v10  ;;  %v2647_v10 = vrot.slane %v3566_v2, 11 }
 0x22b   : > { %v1492_v7 = vmul.f32 %v1463_v47, %v1419_v12 }
 0x22c   : > { %v3775_v23 = vpop.permute.xlu0 %1103 }
 0x22d   : > { %v2730_v47 = vpack.c.bf16 %v1493_v26, %v1492_v7  ;;  %v1113_v42 = vsel %vm1105_vm7, %v3775_v23, %v3278_v52  ;;  %v3788_v27 = vpop.permute.xlu1 %1248  ;;  %v1447_v26 = vrot.slane %v3566_v2, %v3361_v34  ;;  %v1352_v52 = vmul.f32 %v3591_v13, %v1257_v53 }
 0x22e   : > { %v1186_v12 = vmul.f32 %v3655_v14, %v1113_v42  ;;  %v1258_v7 = vsel %vm1250_vm6, %v3788_v27, %v3336_v15  ;;  %v3810_v42 = vrot.slane %v1137_v54, %v3400_v16  ;;  %v3813_v15 = vrot.slane %v1141_v9, %v3400_v16 }
 0x22f   : > { %v1528_v22 = vrot.slane %v2730_v47, 6  ;;  %v1351_v30 = vmul.f32 %v3662_v6, %v1258_v7  ;;  %v996_v13 = vrot.slane %v3573_v25, %v3419_v29  ;;  %v3822_v47 = vrot.slane %v1443_v1, %v3361_v34 }
 0x230   : > { %v2722_v56 = vpack.c.bf16 %v1187_v55, %v1186_v12  ;;  %v3807_v14 = vpop.permute.xlu0 %936  ;;  %v1274_v54 = vmul.f32 %v2647_v10, %v3566_v2  ;;  %v1046_v55 = vmul.f32 %v3621_v51, %v947_v5  ;;  %v1000_v1 = vrot.slane %v3608_v28, %v3400_v16 }
 0x231   : > { %1536 = vst [vmem:[#allocation2 + $0x30] sm:$0xcc] %v1528_v22  ;;  %v2726_v53 = vpack.c.bf16 %v1352_v52, %v1351_v30  ;;  %v948_v57 = vsel %vm940_vm8, %v3807_v14, %v3304_v62  ;;  %v1587_v6 = vpop.permute.xlu1 %1586  ;;  %v1302_v2 = vrot.slane %v3578_v41, %v3419_v29  ;;  %v3840_v52 = vrot.slane %v1447_v26, %v3361_v34 }
 0x232   : > { %v1222_v9 = vrot.slane %v2722_v56, 6  ;;  %v1045_v12 = vmul.f32 %v3668_v36, %v948_v57  ;;  %v1594_v25 = vsel %vm1592_vm0, %v1587_v6, %v3558_v35  ;;  %v1595_v62 = vsel %vm1592_vm0, %v3521_v39, %v1587_v6 }
 0x233   : > { %1391 = vst [vmem:[#allocation2 + $0x30] sm:$0x33] %v2726_v53  ;;  %v1678_v7 = vmul.f32 %v3703_v32, %v1594_v25  ;;  %v1677_v36 = vmul.f32 %v3682_v50, %v1595_v62  ;;  %v3843_v5 = vrot.slane %v996_v13, %v3400_v16  ;;  %v1306_v32 = vrot.slane %v1274_v54, %v3400_v16  ;;  %v4125_v62 = vld [vmem:[#allocation28_spill] sm:$0xff] }
 0x234   : > { %1230 = vst [vmem:[#allocation2] sm:$0xcc] %v1222_v9  ;;  %v2718_v51 = vpack.c.bf16 %v1046_v55, %v1045_v12  ;;  %v2038_v10 = vpop.permute.xlu0 %2037  ;;  %v1310_v50 = vrot.slane %v1274_v54, %v3419_v29  ;;  %v3863_v13 = vrot.slane %v1000_v1, %v3400_v16  ;;  %v3866_v29 = vrot.slane %v1302_v2, %v3400_v16  ;;  %v4124_v12 = vld [vmem:[#allocation19_spill] sm:$0xff] }
 0x235   : > { %v2045_v39 = vsel %vm2043_vm2, %v2038_v10, %v3561_v8  ;;  %v2046_v28 = vsel %vm2043_vm2, %v3513_v38, %v2038_v10  ;;  %v1591_v41 = vpop.permute.xlu1 %1590  ;;  %v2740_v22 = vpack.c.bf16 %v1678_v7, %v1677_v36  ;;  %v3880_v54 = vrot.slane %v1306_v32, %v3400_v16  ;;  %v4127_v36 = vld [vmem:[#allocation30_spill] sm:$0xff]  ;;  %v4128_v10 = vld [vmem:[#allocation16_spill] sm:$0xff] }
 0x236   : > { %1085 = vst [vmem:[#allocation2] sm:$0x33] %v2718_v51  ;;  %v2128_v34 = vmul.f32 %v3709_v58, %v2046_v28  ;;  %v2129_v26 = vmul.f32 %v3712_v21, %v2045_v39  ;;  %v1593_v30 = vsel %vm1592_vm0, %v3558_v35, %v1591_v41  ;;  %v1600_v56 = vsel %vm1592_vm0, %v1591_v41, %v3268_v48  ;;  %v4129_v39 = vld [vmem:[#allocation25_spill] sm:$0xff]  ;;  %v4130_v28 = vld [vmem:[#allocation20_spill] sm:$0xff]  ;;  %v4131_v32 = vld [vmem:[#allocation18_spill] sm:$0xff] }
 0x237   : > { %v1679_v38 = vmul.f32 %v3715_v61, %v1593_v30  ;;  %v1109_v21 = vsel %vm1105_vm7, %v3460_v24, %v3600_v20  ;;  %v1711_v58 = vrot.slane %v2740_v22, 6  ;;  %v1680_v35 = vmul.f32 %v3726_v19, %v1600_v56 }
 0x238   : > { %v2752_v53 = vpack.c.bf16 %v2129_v26, %v2128_v34  ;;  %v2042_v57 = vpop.permute.xlu0 %2041  ;;  %v3883_v55 = vrot.slane %v1310_v50, %v3400_v16  ;;  %v1415_v16 = vsel %vm1411_vm4, %v3421_v31, %v3613_v33  ;;  %v1254_v31 = vsel %vm1250_vm6, %v4128_v10, %v4127_v36 }
 0x239   : > { %v2044_v48 = vsel %vm2043_vm2, %v3561_v8, %v2042_v57  ;;  %v2051_v61 = vsel %vm2043_vm2, %v2042_v57, %v3262_v46  ;;  %v1732_v6 = vpop.permute.xlu1 %1731  ;;  %1719 = vst [vmem:[#allocation2 + $0x28] sm:$0xcc] %v1711_v58  ;;  %v2741_v24 = vpack.c.bf16 %v1680_v35, %v1679_v38  ;;  %v3891_v46 = vmul.f32 %v3629_v44, %v1109_v21  ;;  %v4132_v38 = vld [vmem:[#allocation21_spill] sm:$0xff]  ;;  %v4133_v58 = vld [vmem:[#allocation22_spill] sm:$0xff]  ;;  %v4134_v35 = vld [vmem:[#allocation15_spill] sm:$0xff] }
 0x23a   : > { %2166 = vst [vmem:[#allocation2 + $0x70] sm:$0x33] %v2752_v53  ;;  %v2130_v19 = vmul.f32 %v3729_v37, %v2044_v48  ;;  %v2131_v9 = vmul.f32 %v3738_v18, %v2051_v61  ;;  %v1739_v8 = vsel %vm1737_vm1, %v1732_v6, %v3575_v45  ;;  %v1740_v25 = vsel %vm1737_vm1, %v4124_v12, %v1732_v6  ;;  %v4126_v18 = vld [vmem:[#allocation17_spill] sm:$0xff] }
 0x23b   : > { %v1843_v37 = vmul.f32 %v3754_v49, %v1739_v8  ;;  %v944_v7 = vsel %vm940_vm8, %v4126_v18, %v4125_v62  ;;  %v1712_v1 = vrot.slane %v2741_v24, 6  ;;  %v1842_v44 = vmul.f32 %v3741_v17, %v1740_v25  ;;  %v4139_v25 = vld [vmem:[#allocation14_spill] sm:$0xff] }
 0x23c   : > { %v2753_v2 = vpack.c.bf16 %v2131_v9, %v2130_v19  ;;  %v1893_v51 = vpop.permute.xlu0 %1892  ;;  %v1412_v49 = vsel %vm1411_vm4, %v4129_v39, %v3733_v40  ;;  %v3926_v21 = vmul.f32 %v4132_v38, %v1415_v16  ;;  %v3929_v53 = vmul.f32 %v4133_v58, %v944_v7  ;;  %v4137_v9 = vld [vmem:[#allocation23_spill] sm:$0xff]  ;;  %v4138_v16 = vld [vmem:[#allocation32_spill] sm:$0xff] }
 0x23d   : > { %v1900_v41 = vsel %vm1898_vm3, %v1893_v51, %v4130_v28  ;;  %v1901_v50 = vsel %vm1898_vm3, %v4131_v32, %v1893_v51  ;;  %v2839_v17 = vld [vmem:[#allocation2] ss:$48 sps:$4 sm:$0xff]   ;;  %v2841_v22 = vld [vmem:[#allocation2 + $0x4] ss:$48 sps:$4 sm:$0xff]   ;;  %v1736_v34 = vpop.permute.xlu1 %1735  ;;  %1720 = vst [vmem:[#allocation2 + $0x40] sm:$0xcc] %v1712_v1  ;;  %v2744_v26 = vpack.c.bf16 %v1843_v37, %v1842_v44  ;;  %v1106_v8 = vsel %vm1105_vm7, %v4137_v9, %v3775_v23 }
 0x23e   : > { %2167 = vst [vmem:[#allocation2 + $0x90] sm:$0x33] %v2753_v2  ;;  %v1983_v30 = vmul.f32 %v3744_v59, %v1901_v50  ;;  %v1984_v56 = vmul.f32 %v3747_v11, %v1900_v41  ;;  %v1738_v40 = vsel %vm1737_vm1, %v3575_v45, %v1736_v34  ;;  %2332 = vmatprep.subr.bf16.mxu0 %v2841_v22  ;;  %v4135_v59 = vld [vmem:[#allocation24_spill] sm:$0xff]  ;;  %v4136_v11 = vld [vmem:[#allocation26_spill] sm:$0xff]  ;;  %v4140_v44 = vld [vmem:[#allocation31_spill] sm:$0xff] }
 0x23f   : > { %v1745_v57 = vsel %vm1737_vm1, %v1736_v34, %v4134_v35  ;;  %v1844_v48 = vmul.f32 %v3757_v4, %v1738_v40  ;;  %v3936_v61 = vmul.f32 %v4135_v59, %v1254_v31  ;;  %v3939_v6 = vmul.f32 %v4136_v11, %v1412_v49  ;;  %1880 = vst [vmem:[#allocation2 + $0x98] sm:$0x33] %v2744_v26  ;;  %v4141_v49 = vld [vmem:[#allocation27_spill] sm:$0xff]  ;;  %v4142_v50 = vld [vmem:[#allocation29_spill] sm:$0xff] }
 0x240   : > { %v2748_v45 = vpack.c.bf16 %v1984_v56, %v1983_v30  ;;  %v1845_v24 = vmul.f32 %v3760_v63, %v1745_v57  ;;  %v1897_v19 = vpop.permute.xlu0 %1896  ;;  %2333 = vmatpush1.bf16.msra.mxu0 %v2839_v17  ;;  %v941_v4 = vsel %vm940_vm8, %v4138_v16, %v3807_v14 }
 0x241   : > { %v1899_v12 = vsel %vm1898_vm3, %v4130_v28, %v1897_v19  ;;  %v1906_v63 = vsel %vm1898_vm3, %v1897_v19, %v4139_v25  ;;  %v1100_v37 = vpop.permute.xlu1 %1099  ;;  %v2187_v18 = vld [vmem:[#allocation2 + $0x70] sm:$0x33]  ;;  %v1193_v28 = vmul.f32 %v4141_v49, %v1106_v8  ;;  %v1052_v17 = vmul.f32 %v4142_v50, %v941_v4 }
 0x242   : > { %v2017_v7 = vrot.slane %v2748_v45, 6  ;;  %v2745_v1 = vpack.c.bf16 %v1845_v24, %v1844_v48  ;;  %v1985_v2 = vmul.f32 %v3769_v0, %v1899_v12  ;;  %v1986_v23 = vmul.f32 %v3778_v43, %v1906_v63 }
 0x243   : > { %2705 = vmatmul.mubr.msk.bf16.vlgmr.msra.gmra.mxu0 %vm2289_vm9, %v4140_v44  ;;  %v1107_v14 = vsel %vm1105_vm7, %v1100_v37, %v4137_v9  ;;  %v1108_v51 = vsel %vm1105_vm7, %v3600_v20, %v1100_v37  ;;  %v2701_v10 = vcombine.high %v2187_v18, %v2187_v18  ;;  %v2700_v31 = vcombine.low %v2187_v18, %v2187_v18 }
 0x244   : > { %2025 = vst [vmem:[#allocation2 + $0x98] sm:$0xcc] %v2017_v7  ;;  %1881 = vst [vmem:[#allocation2 + $0x60] sm:$0x33] %v2745_v1  ;;  %v2749_v0 = vpack.c.bf16 %v1986_v23, %v1985_v2  ;;  %v1191_v43 = vmul.f32 %v3810_v42, %v1108_v51  ;;  %v1192_v41 = vmul.f32 %v3813_v15, %v1107_v14  ;;  %v1406_v32 = vpop.permute.xlu0 %1405  ;;  %2432 = vmatprep.mubr.bf16.mxu0 %v4123_v60  ;;  %v2180_v4 = vld [vmem:[#allocation2 + $0x40] sm:$0xff] }
 0x245   : > { %2708 = vmatprep.subr.msk.bf16.mxu0 %vm2293_vm5, %v2701_v10  ;;  %v1413_v20 = vsel %vm1411_vm4, %v1406_v32, %v4129_v39  ;;  %v1414_v22 = vsel %vm1411_vm4, %v3613_v33, %v1406_v32  ;;  %v2307_v34 = vsel %vm2293_vm5, %v2700_v31, 0  ;;  %v933_v42 = vpop.permute.xlu1 %932  ;;  %v2188_v26 = vld [vmem:[#allocation2 + $0x90] sm:$0x33] }
 0x246   : > { %v2018_v15 = vrot.slane %v2749_v0, 6  ;;  %v2724_v30 = vpack.c.bf16 %v1191_v43, %v3891_v46  ;;  %v2725_v60 = vpack.c.bf16 %v1193_v28, %v1192_v41  ;;  %v1497_v56 = vmul.f32 %v3822_v47, %v1414_v22  ;;  %2411 = vmatpush1.bf16.msra.mxu0 %v2307_v34 }
 0x247   : > { %v1498_v40 = vmul.f32 %v3840_v52, %v1413_v20  ;;  %v942_v39 = vsel %vm940_vm8, %v933_v42, %v4138_v16  ;;  %v943_v33 = vsel %vm940_vm8, %v4125_v62, %v933_v42  ;;  %v2703_v38 = vcombine.high %v2188_v26, %v2188_v26 }
 0x248   : > { %2026 = vst [vmem:[#allocation2 + $0x60] sm:$0xcc] %v2018_v15  ;;  %v1224_v58 = vrot.slane %v2724_v30, 6  ;;  %v1225_v35 = vrot.slane %v2725_v60, 6  ;;  %v2732_v46 = vpack.c.bf16 %v1497_v56, %v3926_v21  ;;  %v1050_v57 = vmul.f32 %v3843_v5, %v943_v33  ;;  %v1245_v47 = vpop.permute.xlu0 %1244 }
 0x249   : > { %v2733_v48 = vpack.c.bf16 %v3939_v6, %v1498_v40  ;;  %v1051_v52 = vmul.f32 %v3863_v13, %v942_v39  ;;  %2710 = vmatprep.subr.msk.bf16.mxu1 %vm2293_vm5, %v2703_v38  ;;  %v1253_v59 = vsel %vm1250_vm6, %v4127_v36, %v1245_v47  ;;  %v2702_v62 = vcombine.low %v2188_v26, %v2188_v26  ;;  %v1247_v11 = vpop.permute.xlu1 %1246 }
 0x24a   : > { %1232 = vst [vmem:[#allocation2 + $0x50] sm:$0xcc] %v1224_v58  ;;  %1233 = vst [vmem:[#allocation2 + $0x18] sm:$0xcc] %v1225_v35  ;;  %v1530_v45 = vrot.slane %v2732_v46, 6  ;;  %v2720_v21 = vpack.c.bf16 %v1050_v57, %v3929_v53  ;;  %v1356_v5 = vmul.f32 %v3866_v29, %v1253_v59  ;;  %v1251_v6 = vsel %vm1250_vm6, %v1247_v11, %v3788_v27 }
 0x24b   : > { %v1531_v13 = vrot.slane %v2733_v48, 6  ;;  %v2721_v24 = vpack.c.bf16 %v1052_v17, %v1051_v52  ;;  %v2313_v19 = vsel %vm2293_vm5, %v2702_v62, 0  ;;  %v1252_v36 = vsel %vm1250_vm6, %v1245_v47, %v1247_v11  ;;  %v2846_v9 = vld [vmem:[#allocation2 + $0x28] ss:$112 sps:$4 sm:$0xff]   ;;  %v2848_v16 = vld [vmem:[#allocation2 + $0x2c] ss:$112 sps:$4 sm:$0xff]  }
 0x24c   : > { %1538 = vst [vmem:[#allocation2 + $0x78] sm:$0xcc] %v1530_v45  ;;  %1087 = vst [vmem:[#allocation2 + $0x50] sm:$0x33] %v2720_v21  ;;  %v2728_v8 = vpack.c.bf16 %v1356_v5, %v3936_v61  ;;  %2452 = vmatpush1.bf16.msra.mxu1 %v2313_v19  ;;  %v1357_v53 = vmul.f32 %v3880_v54, %v1252_v36  ;;  %v1358_v29 = vmul.f32 %v3883_v55, %v1251_v6 }
 0x24d   : > { %1539 = vst [vmem:[#allocation2 + $0x80] sm:$0xcc] %v1531_v13  ;;  %1088 = vst [vmem:[#allocation2 + $0x18] sm:$0x33] %v2721_v24  ;;  %2412 = vmatprep.subr.bf16.mxu0 %v2848_v16 }
 0x24e   : > { %1393 = vst [vmem:[#allocation2 + $0x78] sm:$0x33] %v2728_v8  ;;  %v2729_v27 = vpack.c.bf16 %v1358_v29, %v1357_v53  ;;  %2413 = vmatpush1.bf16.msra.mxu0 %v2846_v9 }
 0x24f   : > { %v2184_v3 = vld [vmem:[#allocation2 + $0x60] sm:$0xff] }
 0x250   : > { %1394 = vst [vmem:[#allocation2 + $0x80] sm:$0x33] %v2729_v27  ;;  %v2694_v12 = vcombine.low %v2180_v4, %v2184_v3  ;;  %v2695_v25 = vcombine.high %v2180_v4, %v2184_v3 }
 0x252   : > { %2453 = vmatprep.subr.bf16.mxu1 %v2695_v25 }
 0x253   : > { %2454 = vmatpush1.bf16.msra.mxu1 %v2694_v12 }
 0x255   : > { %v2849_v61 = vld [vmem:[#allocation2 + $0x50] ss:$40 sps:$4 sm:$0xff]   ;;  %v2851_v63 = vld [vmem:[#allocation2 + $0x54] ss:$40 sps:$4 sm:$0xff]   ;;  %v2486_v37 = vpop.permute.xlu0 %2485 }
 0x256   : > { %2414 = vmatprep.subr.bf16.mxu0 %v2851_v63  ;;  %v2500_v7 = vpop.permute.xlu1 %2499 }
 0x257   : > { %v2852_v54 = vld [vmem:[#allocation2 + $0x18] ss:$104 sps:$4 sm:$0xff]   ;;  %v2854_v55 = vld [vmem:[#allocation2 + $0x1c] ss:$104 sps:$4 sm:$0xff]   ;;  %2415 = vmatpush1.bf16.msra.mxu0 %v2849_v61 }
 0x258   : > { %2455 = vmatprep.subr.bf16.mxu1 %v2854_v55 }
 0x259   : > { %2456 = vmatpush1.bf16.msra.mxu1 %v2852_v54 }
 0x25a   : > { %2709 = vmatmul.mubr.msk.bf16.vlgmr.msra.gmra.mxu0 %vm2289_vm9, %v4140_v44 }
 0x25c   : > { %2711 = vmatmul.mubr.msk.bf16.vlgmr.msra.gmra.mxu1 %vm2289_vm9, %v4140_v44 }
 0x2e8   : > { %v2393_v18 = vpop.f32.mrf.mxu1 }
 0x2e9   : > { %v2490_v1 = vmul.f32 %v2486_v37, %v2393_v18 }
 0x2ea   : > { %v2395_v2 = vpop.f32.mrf.mxu1 }
 0x2eb   : > { %v2491_v23 = vmul.f32 %v2486_v37, %v2395_v2  ;;  %v2504_v14 = vadd.f32 %v2500_v7, %v2490_v1 }
 0x2ec   : > { %v2397_v51 = vpop.f32.mrf.mxu1 }
 0x2ed   : > { %v2505_v10 = vadd.f32 %v2500_v7, %v2491_v23  ;;  %v2512_v31 = vmax.f32 %v2504_v14, 0.0 }
 0x2ee   : > { %v2398_v49 = vpop.f32.mrf.mxu1 }
 0x2ef   : > { %v2513_v28 = vmax.f32 %v2505_v10, 0.0  ;;  %2520 = vst [vmem:[%s4012_s17 + $0x10] sm:$0xff] %v2512_v31 }
 0x2f1   : > { %2521 = vst [vmem:[%s4012_s17 + $0x18] sm:$0xff] %v2513_v28 }
 0x303   : > { %v2352_v44 = vpop.f32.mrf.mxu0 }
 0x304   : > { %v2488_v0 = vmul.f32 %v2486_v37, %v2352_v44 }
 0x305   : > { %v2354_v43 = vpop.f32.mrf.mxu0 }
 0x306   : > { %v2502_v41 = vadd.f32 %v2500_v7, %v2488_v0  ;;  %v2489_v32 = vmul.f32 %v2486_v37, %v2354_v43 }
 0x307   : > { %v2356_v50 = vpop.f32.mrf.mxu0 }
 0x308   : > { %v2510_v17 = vmax.f32 %v2502_v41, 0.0  ;;  %v2503_v20 = vadd.f32 %v2500_v7, %v2489_v32 }
 0x309   : > { %v2357_v22 = vpop.f32.mrf.mxu0 }
 0x30a   : > { %2518 = vst [vmem:[%s4012_s17] sm:$0xff] %v2510_v17  ;;  %v2511_v34 = vmax.f32 %v2503_v20, 0.0 }
 0x30c   : > { %2519 = vst [vmem:[%s4012_s17 + $0x8] sm:$0xff] %v2511_v34 }
 0x31a   : > { %v2434_v42 = vpop.f32.mrf.mxu0 }
 0x31b   : > { %v2492_v26 = vmul.f32 %v2486_v37, %v2434_v42 }
 0x31c   : > { %v2436_v15 = vpop.f32.mrf.mxu0  ;;  %v2475_v30 = vpop.f32.mrf.mxu1 }
 0x31d   : > { %v2506_v60 = vadd.f32 %v2500_v7, %v2492_v26  ;;  %v2493_v56 = vmul.f32 %v2486_v37, %v2436_v15  ;;  %v2494_v40 = vmul.f32 %v2486_v37, %v2475_v30 }
 0x31e   : > { %v2438_v39 = vpop.f32.mrf.mxu0  ;;  %v2477_v33 = vpop.f32.mrf.mxu1 }
 0x31f   : > { %v2514_v38 = vmax.f32 %v2506_v60, 0.0  ;;  %v2507_v58 = vadd.f32 %v2500_v7, %v2493_v56  ;;  %v2508_v35 = vadd.f32 %v2500_v7, %v2494_v40  ;;  %v2495_v46 = vmul.f32 %v2486_v37, %v2477_v33 }
 0x320   : > { %v2439_v57 = vpop.f32.mrf.mxu0  ;;  %v2479_v47 = vpop.f32.mrf.mxu1 }
 0x321   : > { %2522 = vst [vmem:[%s4012_s17 + $0x20] sm:$0xff] %v2514_v38  ;;  %v2515_v48 = vmax.f32 %v2507_v58, 0.0  ;;  %v2516_v52 = vmax.f32 %v2508_v35, 0.0  ;;  %v2509_v59 = vadd.f32 %v2500_v7, %v2495_v46 }
 0x322   : > { %v2480_v62 = vpop.f32.mrf.mxu1 }
 0x323   : > { %2523 = vst [vmem:[%s4012_s17 + $0x28] sm:$0xff] %v2515_v48  ;;  %2524 = vst [vmem:[%s4012_s17 + $0x30] sm:$0xff] %v2516_v52  ;;  %v2517_v11 = vmax.f32 %v2509_v59, 0.0 }
 0x325   : > { %2525 = vst [vmem:[%s4012_s17 + $0x38] sm:$0xff] %v2517_v11 }
 0x326   : > { %2922 = shalt.err (!%p2919_p0)
}
 0x327   : > { %s2923_s14 = scalar_lea.hbm %s2539_s25, 1024  ;;  %s2927_s20 = scalar_lea.hbm %s4066_s8, 2048 }
 0x328   : > { %p2924_p5 = scmp.ne.s32.totalorder %s2539_s25, %s2923_s14  ;;  %p2928_p1 = scmp.lt.s32.totalorder %s2539_s25, %s4066_s8 }
 0x329   : > { %p2929_p4 = scmp.lt.s32.totalorder %s2927_s20, %s2923_s14 }
 0x32a   : > { %p2925_p9 = pnand %p2924_p5, %p4143_p3 }
 0x32b   : > { %p2930_p6 = por %p2929_p4, %p2928_p1 }
 0x32c   : > { %p2926_p12 = pneg %p2925_p9 }
 0x32e   : > { %p2931_p8 = pnand %p2930_p6, %p2926_p12 }
 0x330   : > { %2934 = shalt.err (!%p2931_p8)
}
 0x331   : > { %2761 = dma.vmem_to_hbm [thread:$0]  (%p4143_p3), %s2542_s1, 1024, %s2539_s25, %s2527_s23  }
 0x332 PF: > { %s2553_s17 = sand.u32 1, %s2965_s27   ;;  %p4144_p11 = scmp.ne.s32.totalorder %s4091_s12, 0 }
 0x333   : > { %p4145_p7 = scmp.ge.s32.totalorder %s2977_s30, 2  ;;  %s2554_s24 = scalar_lea.sflag [#allocation5], %s2553_s17 }
 0x335   : > { %p2772_p10 = pnand %p4145_p7, %p4144_p11 }
 0x337   : > { %p2773_p2 = pneg %p2772_p10 }
 0x339   : > { %2960 = dma.done.wait (%p2773_p2), %s2554_s24, 1024  }
 0x33a   : > { %2962 = vsyncadd (%p2773_p2), %s2554_s24, 4294966272  ;;  %s4146_s30 = sld [smem:[#allocation12_spill]]  ;;  %s4148_s27 = smov %s2969_s28 }
 0x33b   : > { %s4147_s11 = sld [smem:[#allocation13_spill]]  ;;  %s4149_s28 = smov %s2973_s29 }
 0x340   : > { %p22_p13 = scmp.ge.s32.totalorder %s4146_s30, 4  }
 0x341   : > { %s4150_s29 = smov %s4147_s11 }
 0x342   :  { %24 = sbr.rel (!%p22_p13) target bundleno = 8 (0x8), region = 101 }
 0x347   :  { %2559 = vsyncpa [#allocation4], 1 }
 0x348   :  { %2561 = vsyncpa [#allocation4 + $0x1], 1 }
 0x349   :  { %2562 = vsyncpa [#allocation7], 1 }
 0x34a   :  { %2563 = vsyncpa [#allocation5], 1 }
 0x34b   :  { %2565 = vsyncpa [#allocation5 + $0x1], 1 }

</bundles_post_ra>
